<compile_context>
chip_gen: v5e
topology: v5e:2x2
jax: 0.10.0
libtpu: 0.0.40
codegen_flags: <defaults>
</compile_context>

<pallas_src>
import jax
import jax.numpy as jnp
import numpy as np
from jax.experimental import pallas as pl
from jax.experimental.pallas import tpu as pltpu

EMB = 20          # embedding_dim
HID = 32          # linear / conv / attention width
KSIZE = 4         # conv kernel size (KSIZE * HID == 128 == MXU contraction depth)
PAD_IDX = 0
BN_EPS = 1e-3
FEAT = EMB * 3 + 1 + 2   # 63
OUT_LANES = 128   # lane-dense output block (wrapper slices back to HID)


def _round8(x):
    return ((x + 7) // 8) * 8


def _vmem_capacity_bytes():
    try:
        return int(pltpu.get_tpu_info().vmem_capacity_bytes)
    except Exception:
        return 64 * 1024 * 1024      # conservative default (v7x per-core VMEM)


def _pick_block_b(B, SP, SA, FP, budget_bytes):
    """Largest batch tile whose per-grid-step working set fits the VMEM budget."""
    per_b = (
        2 * SP * FP * 2              # feat tile (bf16, double-buffered)
        + 2 * SP * HID * 2           # broadcast linear mask (bf16, double-buffered)
        + 2 * SA * 4                 # key/query mask tile
        + 2 * OUT_LANES * 4          # lane-padded output tile
        + 6 * SP * HID * 4           # lin / seq + rolled views (f32)
        + 2 * SP * KSIZE * HID * 4   # xcat (+ bf16 copy slack)
        + 4 * SA * HID * 4           # h / h3 / hb / weighted values
        + 6 * SA * SA * 4            # scores / exp / softmax temporaries
    )
    bb = budget_bytes // max(per_b, 1)
    bb = int(max(8, min(bb, 256)))
    bb = min(bb, _round8(B))          # never pad the batch past what is needed
    if B > 8:                         # keep >= 2 grid steps (2 TensorCores on v7x)
        bb = min(bb, _round8((B + 1) // 2))
    return max(8, (bb // 8) * 8)


def cnn_att_pallas(feat, mask, wlin, blin, wconv, bconv, block_b=None):
    """feat: (B, S, FEAT) float32, mask: (B, S) float32 (1 = real step, 0 = pad)."""
    B, S, F = feat.shape
    FP = _round8(F)                   # 63 -> 64
    SA = _round8(S)                   # conv / attention length (sublane aligned)
    SP = SA + 8                       # 1 zero row in front, >=2 zero rows behind

    vmem_cap = _vmem_capacity_bytes()
    BB = block_b if block_b else _pick_block_b(B, SP, SA, FP, vmem_cap // 3)
    BB = max(8, _round8(BB))
    B_pad = ((B + BB - 1) // BB) * BB
    ROWS = BB * SP

    # ---- host-side layout prep (pure XLA, outside the kernel) -----------------
    # Rows outside [1, 1+S) carry zero features and zero mask, which reproduces
    # the Conv1d 'same' zero padding after the masked linear layer.
    featp = jnp.zeros((B_pad, SP, FP), jnp.float32)
    featp = featp.at[:B, 1:1 + S, :F].set(feat.astype(jnp.float32))
    maskp = jnp.zeros((B_pad, SP), jnp.float32)
    maskp = maskp.at[:B, 1:1 + S].set(mask.astype(jnp.float32))

    feat2 = featp.reshape(B_pad * SP, FP).astype(jnp.bfloat16)       # bf16 MXU feed
    maskq = jnp.broadcast_to(maskp.reshape(B_pad * SP, 1),
                             (B_pad * SP, HID)).astype(jnp.bfloat16)  # lane-dense mask
    maskk = maskp[:, 1:1 + SA]                                        # (B_pad, SA) f32
    wlinp = jnp.zeros((FP, HID), jnp.float32).at[:F, :].set(wlin).astype(jnp.bfloat16)
    wconv_cat = wconv.reshape(KSIZE * HID, HID).astype(jnp.bfloat16)  # (128, 32)
    blin2 = jnp.asarray(blin, jnp.float32).reshape(1, HID)
    bconv2 = jnp.asarray(bconv, jnp.float32).reshape(1, HID)

    def make_kernel(use_roll):
        def kernel(feat_ref, mq_ref, mk_ref, wlin_ref, blin_ref,
                   wconv_ref, bconv_ref, out_ref):
            # linear_link + ReLU + padding mask (bf16 MXU inputs, f32 accumulate)
            lin = jnp.dot(feat_ref[...], wlin_ref[...],
                          preferred_element_type=jnp.float32) + blin_ref[...]
            seq = jnp.maximum(lin, 0.0) * mq_ref[...].astype(jnp.float32)
            seq3 = seq.reshape(BB, SP, HID)                    # tile-aligned split

            # Conv1d(k=4, 'same') as one K=128 matmul.  Shifted views come from
            # XLU rolls (shift SP-k == -k); wrap-around only touches each batch's
            # zero tail, which we never read (q + k <= SA-1 + 3 < SP).
            if use_roll:
                views = [seq3[:, :SA, :]] + [
                    pltpu.roll(seq3, shift=SP - k, axis=1)[:, :SA, :]
                    for k in range(1, KSIZE)]
            else:  # fallback: sublane-misaligned slices (correct, slower)
                views = [seq3[:, k:k + SA, :] for k in range(KSIZE)]
            xcat = jnp.concatenate(views, axis=-1)             # (BB, SA, 128)
            h = jnp.dot(xcat.reshape(BB * SA, KSIZE * HID).astype(jnp.bfloat16),
                        wconv_ref[...],
                        preferred_element_type=jnp.float32) + bconv_ref[...]
            h3 = h.reshape(BB, SA, HID)                        # (BB, SA, HID) f32

            # Luong attention: scores on MXU (bf16 in, f32 acc); additive key
            # mask, max-subtraction and exp stay f32 (NaN-safe for masked rows,
            # v5e-safe; bf16 exp only helps on v6e/v7x for very large SA).
            m = mk_ref[...]                                    # (BB, SA)
            hb = h3.astype(jnp.bfloat16)
            scores = jnp.einsum('bqd,bkd->bqk', hb, hb,
                                preferred_element_type=jnp.float32)
            scores = scores - 1e9 * (1.0 - m[:, None, :])
            scores = scores - jnp.max(scores, axis=-1, keepdims=True)
            p = jnp.exp(scores)
            w = p * pl.reciprocal(jnp.sum(p, axis=-1, keepdims=True), approx=True)

            # query mask + sum over queries as VPU/XLU reductions (no M=1 matvecs):
            #   out[b,d] = sum_k (sum_q m[b,q] * w[b,q,k]) * h3[b,k,d]
            mw = jnp.sum(w * m[:, :, None], axis=1)            # (BB, SA)
            out = jnp.sum(mw[:, :, None] * h3, axis=1)         # (BB, HID)

            # lane-dense store: pad HID -> 128 lanes (wrapper slices [:, :HID])
            out_ref[...] = jnp.concatenate(
                [out, jnp.zeros((BB, OUT_LANES - HID), jnp.float32)], axis=-1)
        return kernel

    def run(use_roll):
        return pl.pallas_call(
            make_kernel(use_roll),
            out_shape=jax.ShapeDtypeStruct((B_pad, OUT_LANES), jnp.float32),
            grid_spec=pltpu.PrefetchScalarGridSpec(
                num_scalar_prefetch=0,
                grid=(B_pad // BB,),
                in_specs=[
                    pl.BlockSpec((ROWS, FP), lambda b: (b, 0)),
                    pl.BlockSpec((ROWS, HID), lambda b: (b, 0)),
                    pl.BlockSpec((BB, SA), lambda b: (b, 0)),
                    pl.BlockSpec((FP, HID), lambda b: (0, 0)),
                    pl.BlockSpec((1, HID), lambda b: (0, 0)),
                    pl.BlockSpec((KSIZE * HID, HID), lambda b: (0, 0)),
                    pl.BlockSpec((1, HID), lambda b: (0, 0)),
                ],
                out_specs=pl.BlockSpec((BB, OUT_LANES), lambda b: (b, 0)),
            ),
            compiler_params=pltpu.CompilerParams(
                dimension_semantics=("parallel",),
                vmem_limit_bytes=int(vmem_cap * 3 // 4),
            ),
        )(feat2, maskq, maskk, wlinp, blin2, wconv_cat, bconv2)

    # TODO(synk): for very large S the (SA, SA) score block should be tiled
    # flash-style over key blocks (online softmax); here BB auto-sizing already
    # shrinks the batch tile so the full score matrix fits the VMEM budget.
    try:
        out = jax.block_until_ready(run(use_roll=True))
    except Exception:
        # Older lowerings may not support sublane rolls on this shape/rank.
        out = run(use_roll=False)
    return out[:B, :HID]


def init_params(key, link_num):
    ks = jax.random.split(key, 6)
    link_emb = jax.random.uniform(ks[0], (link_num + 1, EMB), jnp.float32)
    link_emb = link_emb.at[PAD_IDX].set(0.0)                    # padding_idx=0
    status_emb = jax.random.uniform(ks[1], (5, EMB), jnp.float32)
    spl_emb = jax.random.uniform(ks[2], (9, EMB), jnp.float32)
    spl_emb = spl_emb.at[PAD_IDX].set(0.0)                      # padding_idx=0
    wlin = (jax.random.uniform(ks[3], (FEAT, HID), jnp.float32) - 0.5) * 0.2
    blin = (jax.random.uniform(ks[4], (1, HID), jnp.float32) - 0.5) * 0.2
    # PyTorch conv weight layout (out, in, k) -> kernel layout (k, in, out)
    wconv_torch = (jax.random.uniform(ks[5], (HID, HID, KSIZE), jnp.float32) - 0.5) * 0.3
    wconv = jnp.transpose(wconv_torch, (2, 1, 0))
    bconv = jnp.zeros((1, HID), jnp.float32)                    # init zeros_
    # BatchNorm1d eval-mode params (PyTorch defaults): gamma=1, beta=0, rm=0, rv=1
    bn = dict(
        stime_g=jnp.ones((1,), jnp.float32), stime_b=jnp.zeros((1,), jnp.float32),
        stime_m=jnp.zeros((1,), jnp.float32), stime_v=jnp.ones((1,), jnp.float32),
        ls_g=jnp.ones((2,), jnp.float32), ls_b=jnp.zeros((2,), jnp.float32),
        ls_m=jnp.zeros((2,), jnp.float32), ls_v=jnp.ones((2,), jnp.float32),
    )
    return dict(link_emb=link_emb, status_emb=status_emb, spl_emb=spl_emb,
                wlin=wlin, blin=blin, wconv=wconv, bconv=bconv, bn=bn)


def preprocess(train_rnn, p):
    """Embedding lookups + BatchNorm (glue, plain JAX). Returns (feat, mask)."""
    link_id = train_rnn[:, :, 0].astype(jnp.int32)
    stime = train_rnn[:, :, 1:2].astype(jnp.float32)
    status = train_rnn[:, :, 2].astype(jnp.int32)
    len_sp = train_rnn[:, :, 3:5].astype(jnp.float32)
    spl = train_rnn[:, :, 5].astype(jnp.int32)

    id_e = p['link_emb'][link_id]
    st_e = p['status_emb'][status]
    sp_e = p['spl_emb'][spl]

    bn = p['bn']
    # TODO(synk): BatchNorm1d reproduced in eval mode with default running stats;
    # training-mode batch statistics are not reproduced.
    stime_bn = (stime - bn['stime_m']) / jnp.sqrt(bn['stime_v'] + BN_EPS) \
        * bn['stime_g'] + bn['stime_b']
    ls_bn = (len_sp - bn['ls_m']) / jnp.sqrt(bn['ls_v'] + BN_EPS) \
        * bn['ls_g'] + bn['ls_b']

    feat = jnp.concatenate([id_e, stime_bn, st_e, ls_bn, sp_e], axis=-1)  # (B,S,63)
    mask = (spl != PAD_IDX).astype(jnp.float32)                          # (B,S)
    return feat, mask


def reference(feat, mask, wlin, blin, wconv, bconv, mxu_dtype=jnp.float32):
    """Pure-JAX reference of the hot path.  mxu_dtype=bfloat16 reproduces the
    kernel's bf16-MXU-input / f32-accumulate precision for a tight check."""
    c = lambda x: x.astype(mxu_dtype)
    lin = jnp.einsum('bsf,fh->bsh', c(feat), c(wlin),
                     preferred_element_type=jnp.float32) + blin
    seq = jnp.maximum(lin, 0.0) * mask[..., None]
    B, S, _ = seq.shape
    xp = jnp.pad(seq, ((0, 0), (1, 2), (0, 0)))
    h = sum(jnp.einsum('bsi,io->bso', c(xp[:, k:k + S, :]), c(wconv[k]),
                       preferred_element_type=jnp.float32)
            for k in range(KSIZE)) + bconv
    scores = jnp.einsum('bqd,bkd->bqk', c(h), c(h),
                        preferred_element_type=jnp.float32)
    scores = scores - 1e9 * (1.0 - mask[:, None, :])
    w = jax.nn.softmax(scores, axis=-1)
    attn = jnp.einsum('bqk,bkd->bqd', w, h) * mask[..., None]
    return jnp.sum(attn, axis=1)


if __name__ == "__main__":
    B, S, link_num = 2, 8, 50
    key = jax.random.PRNGKey(0)
    kp, kd = jax.random.split(key)
    params = init_params(kp, link_num)

    ks = jax.random.split(kd, 5)
    ids = jax.random.randint(ks[0], (B, S), 1, link_num + 1)
    status = jax.random.randint(ks[1], (B, S), 0, 5)
    spl = jax.random.randint(ks[2], (B, S), 1, 9)
    stime = jax.random.uniform(ks[3], (B, S, 1), jnp.float32)
    lensp = jax.random.uniform(ks[4], (B, S, 2), jnp.float32)

    # pad the last two steps of batch 1 (exercises the PAD_IDX masking)
    pad = jnp.zeros((B, S), bool).at[1, -2:].set(True)
    ids = jnp.where(pad, 0, ids)
    status = jnp.where(pad, 0, status)
    spl = jnp.where(pad, 0, spl)
    stime = jnp.where(pad[..., None], 0.0, stime)
    lensp = jnp.where(pad[..., None], 0.0, lensp)

    train_rnn = jnp.concatenate([
        ids[..., None].astype(jnp.float32), stime,
        status[..., None].astype(jnp.float32), lensp,
        spl[..., None].astype(jnp.float32)], axis=-1)            # (B, S, 6)

    feat, mask = preprocess(train_rnn, params)
    out = cnn_att_pallas(feat, mask, params['wlin'], params['blin'],
                         params['wconv'], params['bconv'])
    out = np.asarray(jax.block_until_ready(out))                 # (B, 32)

    # tight check vs a reference that uses the same bf16 MXU-input precision
    ref_mx = np.asarray(reference(feat, mask, params['wlin'], params['blin'],
                                  params['wconv'], params['bconv'],
                                  mxu_dtype=jnp.bfloat16))
    # loose sanity check vs the full-f32 original-module math
    ref_f32 = np.asarray(reference(feat, mask, params['wlin'], params['blin'],
                                   params['wconv'], params['bconv'],
                                   mxu_dtype=jnp.float32))
    if not np.allclose(out, ref_mx, atol=5e-3, rtol=5e-3):
        raise AssertionError("Pallas kernel mismatch vs bf16-matched reference")
    if not np.allclose(out, ref_f32, atol=5e-2, rtol=5e-2):
        raise AssertionError("Pallas kernel mismatch vs f32 reference")
    print("KERNEL_OK")
</pallas_src>

<mosaic_0001>
module attributes {stable_mosaic.version = 11 : i64} {
  func.func @kernel(%arg0: i32, %arg1: memref<128x64xbf16, #tpu.memory_space<vmem>>, %arg2: memref<128x32xbf16, #tpu.memory_space<vmem>>, %arg3: memref<8x8xf32, #tpu.memory_space<vmem>>, %arg4: memref<64x32xbf16, #tpu.memory_space<vmem>>, %arg5: memref<1x32xf32, #tpu.memory_space<vmem>>, %arg6: memref<128x32xbf16, #tpu.memory_space<vmem>>, %arg7: memref<1x32xf32, #tpu.memory_space<vmem>>, %arg8: memref<8x128xf32, #tpu.memory_space<vmem>>) attributes {dimension_semantics = [#tpu.dimension_semantics<parallel>], iteration_bounds = array<i64: 1>, scalar_prefetch = 0 : i64, scratch_operands = 0 : i64, tpu.core_type = #tpu.core_type<tc>, window_params = [{transform_indices = @transform_0, window_bounds = array<i64: 128, 64>}, {transform_indices = @transform_1, window_bounds = array<i64: 128, 32>}, {transform_indices = @transform_2, window_bounds = array<i64: 8, 8>}, {pipeline_mode = #tpu.pipeline_mode<synchronous>, transform_indices = @transform_3, window_bounds = array<i64: 64, 32>}, {pipeline_mode = #tpu.pipeline_mode<synchronous>, transform_indices = @transform_4, window_bounds = array<i64: 1, 32>}, {pipeline_mode = #tpu.pipeline_mode<synchronous>, transform_indices = @transform_5, window_bounds = array<i64: 128, 32>}, {pipeline_mode = #tpu.pipeline_mode<synchronous>, transform_indices = @transform_6, window_bounds = array<i64: 1, 32>}, {transform_indices = @transform_7, window_bounds = array<i64: 8, 128>}]} {
    %c0 = arith.constant 0 : index
    %c0_0 = arith.constant 0 : index
    %0 = vector.load %arg1[%c0, %c0_0] : memref<128x64xbf16, #tpu.memory_space<vmem>>, vector<128x64xbf16>
    %c0_1 = arith.constant 0 : index
    %c0_2 = arith.constant 0 : index
    %1 = vector.load %arg4[%c0_1, %c0_2] : memref<64x32xbf16, #tpu.memory_space<vmem>>, vector<64x32xbf16>
    %cst = arith.constant dense<0.000000e+00> : vector<128x32xf32>
    %2 = tpu.matmul %0, %1, %cst {dimension_numbers = #tpu.dot_dimension_numbers<[1], [0], [0], [1], [0, 0, 1, 1], [], []>} : vector<128x64xbf16>, vector<64x32xbf16>, vector<128x32xf32> -> vector<128x32xf32>
    %c0_3 = arith.constant 0 : index
    %c0_4 = arith.constant 0 : index
    %3 = vector.load %arg5[%c0_3, %c0_4] : memref<1x32xf32, #tpu.memory_space<vmem>>, vector<1x32xf32>
    %4 = vector.broadcast %3 : vector<1x32xf32> to vector<128x32xf32>
    %5 = arith.addf %2, %4 : vector<128x32xf32>
    %cst_5 = arith.constant 0.000000e+00 : f32
    %6 = vector.broadcast %cst_5 : f32 to vector<128x32xf32>
    %7 = arith.maximumf %5, %6 : vector<128x32xf32>
    %c0_6 = arith.constant 0 : index
    %c0_7 = arith.constant 0 : index
    %8 = vector.load %arg2[%c0_6, %c0_7] : memref<128x32xbf16, #tpu.memory_space<vmem>>, vector<128x32xbf16>
    %9 = arith.extf %8 : vector<128x32xbf16> to vector<128x32xf32>
    %10 = arith.mulf %7, %9 : vector<128x32xf32>
    %11 = vector.shape_cast %10 : vector<128x32xf32> to vector<8x16x32xf32>
    %12 = vector.extract_strided_slice %11 {offsets = [0, 0, 0], sizes = [8, 8, 32], strides = [1, 1, 1]} : vector<8x16x32xf32> to vector<8x8x32xf32>
    %c15_i32 = arith.constant 15 : i32
    %13 = tpu.dynamic_rotate %11 by %c15_i32 dim 1 : vector<8x16x32xf32>, i32 -> vector<8x16x32xf32>
    %14 = vector.extract_strided_slice %13 {offsets = [0, 0, 0], sizes = [8, 8, 32], strides = [1, 1, 1]} : vector<8x16x32xf32> to vector<8x8x32xf32>
    %c14_i32 = arith.constant 14 : i32
    %15 = tpu.dynamic_rotate %11 by %c14_i32 dim 1 : vector<8x16x32xf32>, i32 -> vector<8x16x32xf32>
    %16 = vector.extract_strided_slice %15 {offsets = [0, 0, 0], sizes = [8, 8, 32], strides = [1, 1, 1]} : vector<8x16x32xf32> to vector<8x8x32xf32>
    %c13_i32 = arith.constant 13 : i32
    %17 = tpu.dynamic_rotate %11 by %c13_i32 dim 1 : vector<8x16x32xf32>, i32 -> vector<8x16x32xf32>
    %18 = vector.extract_strided_slice %17 {offsets = [0, 0, 0], sizes = [8, 8, 32], strides = [1, 1, 1]} : vector<8x16x32xf32> to vector<8x8x32xf32>
    %19 = tpu.concatenate %12, %14, %16, %18 in 2 : vector<8x8x32xf32>, vector<8x8x32xf32>, vector<8x8x32xf32>, vector<8x8x32xf32> -> vector<8x8x128xf32>
    %20 = vector.shape_cast %19 : vector<8x8x128xf32> to vector<64x128xf32>
    %21 = arith.truncf %20 : vector<64x128xf32> to vector<64x128xbf16>
    %c0_8 = arith.constant 0 : index
    %c0_9 = arith.constant 0 : index
    %22 = vector.load %arg6[%c0_8, %c0_9] : memref<128x32xbf16, #tpu.memory_space<vmem>>, vector<128x32xbf16>
    %cst_10 = arith.constant dense<0.000000e+00> : vector<64x32xf32>
    %23 = tpu.matmul %21, %22, %cst_10 {dimension_numbers = #tpu.dot_dimension_numbers<[1], [0], [0], [1], [0, 0, 1, 1], [], []>} : vector<64x128xbf16>, vector<128x32xbf16>, vector<64x32xf32> -> vector<64x32xf32>
    %c0_11 = arith.constant 0 : index
    %c0_12 = arith.constant 0 : index
    %24 = vector.load %arg7[%c0_11, %c0_12] : memref<1x32xf32, #tpu.memory_space<vmem>>, vector<1x32xf32>
    %25 = vector.broadcast %24 : vector<1x32xf32> to vector<64x32xf32>
    %26 = arith.addf %23, %25 : vector<64x32xf32>
    %27 = vector.shape_cast %26 : vector<64x32xf32> to vector<8x8x32xf32>
    %c0_13 = arith.constant 0 : index
    %c0_14 = arith.constant 0 : index
    %28 = vector.load %arg3[%c0_13, %c0_14] : memref<8x8xf32, #tpu.memory_space<vmem>>, vector<8x8xf32>
    %29 = arith.truncf %27 : vector<8x8x32xf32> to vector<8x8x32xbf16>
    "tpu.trace_start"() <{level = 10 : i32, message = "bqd,bkd->bqk"}> : () -> ()
    %cst_15 = arith.constant dense<0.000000e+00> : vector<8x8x8xf32>
    %30 = tpu.matmul %29, %29, %cst_15 {dimension_numbers = #tpu.dot_dimension_numbers<[2], [2], [1], [1], [0, 0, 0, 1, 1, 1], [0], [0]>} : vector<8x8x32xbf16>, vector<8x8x32xbf16>, vector<8x8x8xf32> -> vector<8x8x8xf32>
    "tpu.trace_stop"() : () -> ()
    %31 = vector.shape_cast %28 : vector<8x8xf32> to vector<8x1x8xf32>
    %cst_16 = arith.constant 1.000000e+00 : f32
    %32 = vector.broadcast %cst_16 : f32 to vector<8x1x8xf32>
    %33 = arith.subf %32, %31 : vector<8x1x8xf32>
    %cst_17 = arith.constant 1.000000e+09 : f32
    %34 = vector.broadcast %cst_17 : f32 to vector<8x1x8xf32>
    %35 = arith.mulf %34, %33 : vector<8x1x8xf32>
    %36 = vector.broadcast %35 : vector<8x1x8xf32> to vector<8x8x8xf32>
    %37 = arith.subf %30, %36 : vector<8x8x8xf32>
    %cst_18 = arith.constant dense<0xFF800000> : vector<8x8xf32>
    %38 = vector.multi_reduction <maximumf>, %37, %cst_18 [2] : vector<8x8x8xf32> to vector<8x8xf32>
    %39 = vector.shape_cast %38 : vector<8x8xf32> to vector<8x8x1xf32>
    %40 = vector.broadcast %39 : vector<8x8x1xf32> to vector<8x8x8xf32>
    %41 = arith.subf %37, %40 : vector<8x8x8xf32>
    %42 = math.exp %41 : vector<8x8x8xf32>
    %cst_19 = arith.constant dense<0.000000e+00> : vector<8x8xf32>
    %43 = vector.multi_reduction <add>, %42, %cst_19 [2] : vector<8x8x8xf32> to vector<8x8xf32>
    %44 = vector.shape_cast %43 : vector<8x8xf32> to vector<8x8x1xf32>
    %45 = tpu.reciprocal %44 {approx = true} : vector<8x8x1xf32> -> vector<8x8x1xf32>
    %46 = vector.broadcast %45 : vector<8x8x1xf32> to vector<8x8x8xf32>
    %47 = arith.mulf %42, %46 : vector<8x8x8xf32>
    %48 = vector.shape_cast %28 : vector<8x8xf32> to vector<8x8x1xf32>
    %49 = vector.broadcast %48 : vector<8x8x1xf32> to vector<8x8x8xf32>
    %50 = arith.mulf %47, %49 : vector<8x8x8xf32>
    %cst_20 = arith.constant dense<0.000000e+00> : vector<8x8xf32>
    %51 = vector.multi_reduction <add>, %50, %cst_20 [1] : vector<8x8x8xf32> to vector<8x8xf32>
    %52 = vector.shape_cast %51 : vector<8x8xf32> to vector<8x8x1xf32>
    %53 = vector.broadcast %52 : vector<8x8x1xf32> to vector<8x8x32xf32>
    %54 = arith.mulf %53, %27 : vector<8x8x32xf32>
    %cst_21 = arith.constant dense<0.000000e+00> : vector<8x32xf32>
    %55 = vector.multi_reduction <add>, %54, %cst_21 [1] : vector<8x8x32xf32> to vector<8x32xf32>
    %cst_22 = arith.constant 0.000000e+00 : f32
    %56 = vector.broadcast %cst_22 : f32 to vector<8x96xf32>
    %57 = tpu.concatenate %55, %56 in 1 : vector<8x32xf32>, vector<8x96xf32> -> vector<8x128xf32>
    %c0_23 = arith.constant 0 : index
    %c0_24 = arith.constant 0 : index
    %58 = vector.load %arg8[%c0_23, %c0_24] : memref<8x128xf32, #tpu.memory_space<vmem>>, vector<8x128xf32>
    tpu.vector_store %arg8[%c0_23, %c0_24], %57 {strides = array<i32>} : memref<8x128xf32, #tpu.memory_space<vmem>>, vector<8x128xf32>,
    return
  }
  func.func @transform_0(%arg0: i32) -> (i32, i32) {
    %c0_i32 = arith.constant 0 : i32
    %c0_i32_0 = arith.constant 0 : i32
    return %arg0, %c0_i32 : i32, i32
  }
  func.func @transform_1(%arg0: i32) -> (i32, i32) {
    %c0_i32 = arith.constant 0 : i32
    %c0_i32_0 = arith.constant 0 : i32
    return %arg0, %c0_i32 : i32, i32
  }
  func.func @transform_2(%arg0: i32) -> (i32, i32) {
    %c0_i32 = arith.constant 0 : i32
    %c0_i32_0 = arith.constant 0 : i32
    return %arg0, %c0_i32 : i32, i32
  }
  func.func @transform_3(%arg0: i32) -> (i32, i32) {
    %c0_i32 = arith.constant 0 : i32
    %c0_i32_0 = arith.constant 0 : i32
    %c0_i32_1 = arith.constant 0 : i32
    return %c0_i32, %c0_i32_0 : i32, i32
  }
  func.func @transform_4(%arg0: i32) -> (i32, i32) {
    %c0_i32 = arith.constant 0 : i32
    %c0_i32_0 = arith.constant 0 : i32
    %c0_i32_1 = arith.constant 0 : i32
    return %c0_i32, %c0_i32_0 : i32, i32
  }
  func.func @transform_5(%arg0: i32) -> (i32, i32) {
    %c0_i32 = arith.constant 0 : i32
    %c0_i32_0 = arith.constant 0 : i32
    %c0_i32_1 = arith.constant 0 : i32
    return %c0_i32, %c0_i32_0 : i32, i32
  }
  func.func @transform_6(%arg0: i32) -> (i32, i32) {
    %c0_i32 = arith.constant 0 : i32
    %c0_i32_0 = arith.constant 0 : i32
    %c0_i32_1 = arith.constant 0 : i32
    return %c0_i32, %c0_i32_0 : i32, i32
  }
  func.func @transform_7(%arg0: i32) -> (i32, i32) {
    %c0_i32 = arith.constant 0 : i32
    %c0_i32_0 = arith.constant 0 : i32
    return %arg0, %c0_i32 : i32, i32
  }
}

module attributes {stable_mosaic.version = 11 : i64} {
  func.func @kernel(%arg0: i32, %arg1: memref<128x64xbf16, #tpu.memory_space<vmem>>, %arg2: memref<128x32xbf16, #tpu.memory_space<vmem>>, %arg3: memref<8x8xf32, #tpu.memory_space<vmem>>, %arg4: memref<64x32xbf16, #tpu.memory_space<vmem>>, %arg5: memref<1x32xf32, #tpu.memory_space<vmem>>, %arg6: memref<128x32xbf16, #tpu.memory_space<vmem>>, %arg7: memref<1x32xf32, #tpu.memory_space<vmem>>, %arg8: memref<8x128xf32, #tpu.memory_space<vmem>>) attributes {dimension_semantics = [#tpu.dimension_semantics<parallel>], iteration_bounds = array<i64: 1>, scalar_prefetch = 0 : i64, scratch_operands = 0 : i64, tpu.core_type = #tpu.core_type<tc>, window_params = [{transform_indices = @transform_0, window_bounds = array<i64: 128, 64>}, {transform_indices = @transform_1, window_bounds = array<i64: 128, 32>}, {transform_indices = @transform_2, window_bounds = array<i64: 8, 8>}, {pipeline_mode = #tpu.pipeline_mode<synchronous>, transform_indices = @transform_3, window_bounds = array<i64: 64, 32>}, {pipeline_mode = #tpu.pipeline_mode<synchronous>, transform_indices = @transform_4, window_bounds = array<i64: 1, 32>}, {pipeline_mode = #tpu.pipeline_mode<synchronous>, transform_indices = @transform_5, window_bounds = array<i64: 128, 32>}, {pipeline_mode = #tpu.pipeline_mode<synchronous>, transform_indices = @transform_6, window_bounds = array<i64: 1, 32>}, {transform_indices = @transform_7, window_bounds = array<i64: 8, 128>}]} {
    %c0 = arith.constant 0 : index
    %c0_0 = arith.constant 0 : index
    %0 = vector.load %arg1[%c0, %c0_0] : memref<128x64xbf16, #tpu.memory_space<vmem>>, vector<128x64xbf16>
    %c0_1 = arith.constant 0 : index
    %c0_2 = arith.constant 0 : index
    %1 = vector.load %arg4[%c0_1, %c0_2] : memref<64x32xbf16, #tpu.memory_space<vmem>>, vector<64x32xbf16>
    %cst = arith.constant dense<0.000000e+00> : vector<128x32xf32>
    %2 = tpu.matmul %0, %1, %cst {dimension_numbers = #tpu.dot_dimension_numbers<[1], [0], [0], [1], [0, 0, 1, 1], [], []>} : vector<128x64xbf16>, vector<64x32xbf16>, vector<128x32xf32> -> vector<128x32xf32>
    %c0_3 = arith.constant 0 : index
    %c0_4 = arith.constant 0 : index
    %3 = vector.load %arg5[%c0_3, %c0_4] : memref<1x32xf32, #tpu.memory_space<vmem>>, vector<1x32xf32>
    %4 = vector.broadcast %3 : vector<1x32xf32> to vector<128x32xf32>
    %5 = arith.addf %2, %4 : vector<128x32xf32>
    %cst_5 = arith.constant 0.000000e+00 : f32
    %6 = vector.broadcast %cst_5 : f32 to vector<128x32xf32>
    %7 = arith.maximumf %5, %6 : vector<128x32xf32>
    %c0_6 = arith.constant 0 : index
    %c0_7 = arith.constant 0 : index
    %8 = vector.load %arg2[%c0_6, %c0_7] : memref<128x32xbf16, #tpu.memory_space<vmem>>, vector<128x32xbf16>
    %9 = arith.extf %8 : vector<128x32xbf16> to vector<128x32xf32>
    %10 = arith.mulf %7, %9 : vector<128x32xf32>
    %11 = vector.shape_cast %10 : vector<128x32xf32> to vector<8x16x32xf32>
    %12 = vector.extract_strided_slice %11 {offsets = [0, 0, 0], sizes = [8, 8, 32], strides = [1, 1, 1]} : vector<8x16x32xf32> to vector<8x8x32xf32>
    %13 = vector.extract_strided_slice %11 {offsets = [0, 1, 0], sizes = [8, 8, 32], strides = [1, 1, 1]} : vector<8x16x32xf32> to vector<8x8x32xf32>
    %14 = vector.extract_strided_slice %11 {offsets = [0, 2, 0], sizes = [8, 8, 32], strides = [1, 1, 1]} : vector<8x16x32xf32> to vector<8x8x32xf32>
    %15 = vector.extract_strided_slice %11 {offsets = [0, 3, 0], sizes = [8, 8, 32], strides = [1, 1, 1]} : vector<8x16x32xf32> to vector<8x8x32xf32>
    %16 = tpu.concatenate %12, %13, %14, %15 in 2 : vector<8x8x32xf32>, vector<8x8x32xf32>, vector<8x8x32xf32>, vector<8x8x32xf32> -> vector<8x8x128xf32>
    %17 = vector.shape_cast %16 : vector<8x8x128xf32> to vector<64x128xf32>
    %18 = arith.truncf %17 : vector<64x128xf32> to vector<64x128xbf16>
    %c0_8 = arith.constant 0 : index
    %c0_9 = arith.constant 0 : index
    %19 = vector.load %arg6[%c0_8, %c0_9] : memref<128x32xbf16, #tpu.memory_space<vmem>>, vector<128x32xbf16>
    %cst_10 = arith.constant dense<0.000000e+00> : vector<64x32xf32>
    %20 = tpu.matmul %18, %19, %cst_10 {dimension_numbers = #tpu.dot_dimension_numbers<[1], [0], [0], [1], [0, 0, 1, 1], [], []>} : vector<64x128xbf16>, vector<128x32xbf16>, vector<64x32xf32> -> vector<64x32xf32>
    %c0_11 = arith.constant 0 : index
    %c0_12 = arith.constant 0 : index
    %21 = vector.load %arg7[%c0_11, %c0_12] : memref<1x32xf32, #tpu.memory_space<vmem>>, vector<1x32xf32>
    %22 = vector.broadcast %21 : vector<1x32xf32> to vector<64x32xf32>
    %23 = arith.addf %20, %22 : vector<64x32xf32>
    %24 = vector.shape_cast %23 : vector<64x32xf32> to vector<8x8x32xf32>
    %c0_13 = arith.constant 0 : index
    %c0_14 = arith.constant 0 : index
    %25 = vector.load %arg3[%c0_13, %c0_14] : memref<8x8xf32, #tpu.memory_space<vmem>>, vector<8x8xf32>
    %26 = arith.truncf %24 : vector<8x8x32xf32> to vector<8x8x32xbf16>
    "tpu.trace_start"() <{level = 10 : i32, message = "bqd,bkd->bqk"}> : () -> ()
    %cst_15 = arith.constant dense<0.000000e+00> : vector<8x8x8xf32>
    %27 = tpu.matmul %26, %26, %cst_15 {dimension_numbers = #tpu.dot_dimension_numbers<[2], [2], [1], [1], [0, 0, 0, 1, 1, 1], [0], [0]>} : vector<8x8x32xbf16>, vector<8x8x32xbf16>, vector<8x8x8xf32> -> vector<8x8x8xf32>
    "tpu.trace_stop"() : () -> ()
    %28 = vector.shape_cast %25 : vector<8x8xf32> to vector<8x1x8xf32>
    %cst_16 = arith.constant 1.000000e+00 : f32
    %29 = vector.broadcast %cst_16 : f32 to vector<8x1x8xf32>
    %30 = arith.subf %29, %28 : vector<8x1x8xf32>
    %cst_17 = arith.constant 1.000000e+09 : f32
    %31 = vector.broadcast %cst_17 : f32 to vector<8x1x8xf32>
    %32 = arith.mulf %31, %30 : vector<8x1x8xf32>
    %33 = vector.broadcast %32 : vector<8x1x8xf32> to vector<8x8x8xf32>
    %34 = arith.subf %27, %33 : vector<8x8x8xf32>
    %cst_18 = arith.constant dense<0xFF800000> : vector<8x8xf32>
    %35 = vector.multi_reduction <maximumf>, %34, %cst_18 [2] : vector<8x8x8xf32> to vector<8x8xf32>
    %36 = vector.shape_cast %35 : vector<8x8xf32> to vector<8x8x1xf32>
    %37 = vector.broadcast %36 : vector<8x8x1xf32> to vector<8x8x8xf32>
    %38 = arith.subf %34, %37 : vector<8x8x8xf32>
    %39 = math.exp %38 : vector<8x8x8xf32>
    %cst_19 = arith.constant dense<0.000000e+00> : vector<8x8xf32>
    %40 = vector.multi_reduction <add>, %39, %cst_19 [2] : vector<8x8x8xf32> to vector<8x8xf32>
    %41 = vector.shape_cast %40 : vector<8x8xf32> to vector<8x8x1xf32>
    %42 = tpu.reciprocal %41 {approx = true} : vector<8x8x1xf32> -> vector<8x8x1xf32>
    %43 = vector.broadcast %42 : vector<8x8x1xf32> to vector<8x8x8xf32>
    %44 = arith.mulf %39, %43 : vector<8x8x8xf32>
    %45 = vector.shape_cast %25 : vector<8x8xf32> to vector<8x8x1xf32>
    %46 = vector.broadcast %45 : vector<8x8x1xf32> to vector<8x8x8xf32>
    %47 = arith.mulf %44, %46 : vector<8x8x8xf32>
    %cst_20 = arith.constant dense<0.000000e+00> : vector<8x8xf32>
    %48 = vector.multi_reduction <add>, %47, %cst_20 [1] : vector<8x8x8xf32> to vector<8x8xf32>
    %49 = vector.shape_cast %48 : vector<8x8xf32> to vector<8x8x1xf32>
    %50 = vector.broadcast %49 : vector<8x8x1xf32> to vector<8x8x32xf32>
    %51 = arith.mulf %50, %24 : vector<8x8x32xf32>
    %cst_21 = arith.constant dense<0.000000e+00> : vector<8x32xf32>
    %52 = vector.multi_reduction <add>, %51, %cst_21 [1] : vector<8x8x32xf32> to vector<8x32xf32>
    %cst_22 = arith.constant 0.000000e+00 : f32
    %53 = vector.broadcast %cst_22 : f32 to vector<8x96xf32>
    %54 = tpu.concatenate %52, %53 in 1 : vector<8x32xf32>, vector<8x96xf32> -> vector<8x128xf32>
    %c0_23 = arith.constant 0 : index
    %c0_24 = arith.constant 0 : index
    %55 = vector.load %arg8[%c0_23, %c0_24] : memref<8x128xf32, #tpu.memory_space<vmem>>, vector<8x128xf32>
    tpu.vector_store %arg8[%c0_23, %c0_24], %54 {strides = array<i32>} : memref<8x128xf32, #tpu.memory_space<vmem>>, vector<8x128xf32>,
    return
  }
  func.func @transform_0(%arg0: i32) -> (i32, i32) {
    %c0_i32 = arith.constant 0 : i32
    %c0_i32_0 = arith.constant 0 : i32
    return %arg0, %c0_i32 : i32, i32
  }
  func.func @transform_1(%arg0: i32) -> (i32, i32) {
    %c0_i32 = arith.constant 0 : i32
    %c0_i32_0 = arith.constant 0 : i32
    return %arg0, %c0_i32 : i32, i32
  }
  func.func @transform_2(%arg0: i32) -> (i32, i32) {
    %c0_i32 = arith.constant 0 : i32
    %c0_i32_0 = arith.constant 0 : i32
    return %arg0, %c0_i32 : i32, i32
  }
  func.func @transform_3(%arg0: i32) -> (i32, i32) {
    %c0_i32 = arith.constant 0 : i32
    %c0_i32_0 = arith.constant 0 : i32
    %c0_i32_1 = arith.constant 0 : i32
    return %c0_i32, %c0_i32_0 : i32, i32
  }
  func.func @transform_4(%arg0: i32) -> (i32, i32) {
    %c0_i32 = arith.constant 0 : i32
    %c0_i32_0 = arith.constant 0 : i32
    %c0_i32_1 = arith.constant 0 : i32
    return %c0_i32, %c0_i32_0 : i32, i32
  }
  func.func @transform_5(%arg0: i32) -> (i32, i32) {
    %c0_i32 = arith.constant 0 : i32
    %c0_i32_0 = arith.constant 0 : i32
    %c0_i32_1 = arith.constant 0 : i32
    return %c0_i32, %c0_i32_0 : i32, i32
  }
  func.func @transform_6(%arg0: i32) -> (i32, i32) {
    %c0_i32 = arith.constant 0 : i32
    %c0_i32_0 = arith.constant 0 : i32
    %c0_i32_1 = arith.constant 0 : i32
    return %c0_i32, %c0_i32_0 : i32, i32
  }
  func.func @transform_7(%arg0: i32) -> (i32, i32) {
    %c0_i32 = arith.constant 0 : i32
    %c0_i32_0 = arith.constant 0 : i32
    return %arg0, %c0_i32 : i32, i32
  }
}

</mosaic_0001>

<bundles_post_ra>
// kernel: tpu_custom_call.1
= control target key start
LH: loop header
LB: loop body
LE: loop exit
PB: predicated region body
PF: predicated region fallthrough
CT: control target
= control target key end

     0   :  { %s1888_s0 = inlined_call_operand.vmem [shape: bf16[128,64], index: 0, kind: input, shape index: {}]   ;;  %s1889_s1 = inlined_call_operand.vmem [shape: bf16[128,32], index: 1, kind: input, shape index: {}]   ;;  %s1890_s2 = inlined_call_operand.vmem [shape: f32[8,8], index: 2, kind: input, shape index: {}]   ;;  %s1891_s3 = inlined_call_operand.vmem [shape: bf16[64,32], index: 3, kind: input, shape index: {}]   ;;  %s1892_s4 = inlined_call_operand.vmem [shape: f32[1,32], index: 4, kind: input, shape index: {}]   ;;  %s1893_s5 = inlined_call_operand.vmem [shape: bf16[128,32], index: 5, kind: input, shape index: {}]   ;;  %s1894_s6 = inlined_call_operand.vmem [shape: f32[1,32], index: 6, kind: input, shape index: {}]   ;;  %s1895_s7 = inlined_call_operand.hbm [shape: f32[8,128], index: 7, kind: output, shape index: {}]  }
   0x1   :  { %v1227_v0 = vld [vmem:[%s1891_s3 + $0x18] sm:$0xff]  ;;  %v1226_v1 = vld [vmem:[%s1891_s3 + $0x10] sm:$0xff] }
   0x2   :  { %149 = vmatpush.bf16.msra.mxu0 %v1227_v0  ;;  %1275 = vmatpush.bf16.msra.mxu2 %v1227_v0 }
   0x3   :  { %12 = vsyncpa [#allocation3], 0  ;;  %v1225_v2 = vld [vmem:[%s1891_s3 + $0x8] sm:$0xff]  ;;  %v1224_v3 = vld [vmem:[%s1891_s3] sm:$0xff]  ;;  %vm120_vm0 = vcmask 523264   ;;  %v274_v12 = vlaneseq  ;;  %s1407_s29 = smov 32  }
   0x4   :  { %v1216_v4 = vld [vmem:[%s1888_s0] sm:$0xff]  ;;  %v1217_v5 = vld [vmem:[%s1888_s0 + $0x8] sm:$0xff]  ;;  %v1222_v6 = vld [vmem:[%s1888_s0 + $0x30] sm:$0xff]  ;;  %s1408_s30 = smov 64   ;;  %vm431_vm4 = vcmask 261120   ;;  %vm448_vm5 = vcmask 785408  }
   0x5   :  { %v1218_v7 = vld [vmem:[%s1888_s0 + $0x10] sm:$0xff]  ;;  %v1223_v8 = vld [vmem:[%s1888_s0 + $0x38] sm:$0xff]  ;;  %v1220_v10 = vld [vmem:[%s1888_s0 + $0x20] sm:$0xff]  ;;  %v1494_v13 = vshrl.u32 %v274_v12, 7  ;;  %vm758_vm6 = vcmask 64512   ;;  %vm1087_vm7 = vcmask 1041409  }
   0x6   :  { %150 = vmatpush.bf16.msra.mxu0 %v1226_v1  ;;  %1276 = vmatpush.bf16.msra.mxu2 %v1226_v1  ;;  %v1219_v9 = vld [vmem:[%s1888_s0 + $0x18] sm:$0xff]  ;;  %v1221_v11 = vld [vmem:[%s1888_s0 + $0x28] sm:$0xff]  ;;  %v1502_v16 = vld [vmem:[%s1892_s4] ss:$0 sm:$0xff]  ;;  %s1406_s4 = smov 96   ;;  %vm1089_vm8 = vcmask 1042434  }
   0x7   :  { %1344 = vset.pattern.permute.xlu1 %v1494_v13  ;;  %1345 = vset.pattern.permute.xlu2 %v1494_v13  ;;  %v1237_v20 = vld [vmem:[%s1889_s1] sm:$0xff]   ;;  %v1268_v22 = vld [vmem:[%s1889_s1 + $0x8] sm:$0xff]   ;;  %vm326_vm1 = vcmp.lt.s32.totalorder %v1494_v13, 5  ;;  %vm276_vm2 = vcmp.lt.s32.totalorder %v1494_v13, 7  ;;  %vm301_vm3 = vcmp.lt.s32.totalorder %v1494_v13, 6  ;;  %v1269_v63 = vld [vmem:[%s1889_s1 + $0x10] sm:$0xff]  }
   0x8   :  { %1343 = vset.pattern.permute.xlu0 %v1494_v13  ;;  %v1239_v24 = vunpack.c.h.bf16 %v1237_v20  ;;  %v1238_v26 = vunpack.c.l.bf16 %v1237_v20  ;;  %v1242_v28 = vunpack.c.l.bf16 %v1268_v22  ;;  %v1243_v32 = vunpack.c.h.bf16 %v1268_v22  ;;  %v1228_v13 = vld [vmem:[%s1893_s5] sm:$0xff]  ;;  %s1111_s14 = sshll.u32 %s1895_s7, 4  ;;  %s1112_s14 = int_to_ptr.hbm [resolvable:$true] %s1111_s14 }
   0x9   :  { %vm1091_vm9 = vcmask 1043459   ;;  %vm1093_vm10 = vcmask 1044484   ;;  %vm1095_vm11 = vcmask 1045509   ;;  %vm1097_vm12 = vcmask 1046534  }
   0xa   :  { %151 = vmatpush.bf16.msra.mxu0 %v1225_v2  ;;  %1277 = vmatpush.bf16.msra.mxu2 %v1225_v2  ;;  %v1270_v2 = vld [vmem:[%s1889_s1 + $0x18] sm:$0xff]   ;;  %vm1099_vm13 = vcmask 1047559  }
   0xb   :  { %v1251_v12 = vunpack.c.h.bf16 %v1270_v2 }
   0xe   :  { %152 = vmatpush.bf16.msra.mxu0 %v1224_v3  ;;  %1278 = vmatpush.bf16.msra.mxu2 %v1224_v3 }
  0x11   :  { %1168 = vmatmul.msk.bf16.vlgmr.msra.gmra.mxu0 %vm120_vm0, %v1216_v4  ;;  %1174 = vmatmul.msk.bf16.vlgmr.msra.gmra.mxu2 %vm120_vm0, %v1222_v6  ;;  %v1247_v4 = vunpack.c.h.bf16 %v1269_v63  ;;  %v1246_v6 = vunpack.c.l.bf16 %v1269_v63 }
  0x21   :  { %1169 = vmatmul.msk.bf16.gmra.mxu0 %vm120_vm0, %v1217_v5  ;;  %1175 = vmatmul.msk.bf16.gmra.mxu2 %vm120_vm0, %v1223_v8  ;;  %v1250_v8 = vunpack.c.l.bf16 %v1270_v2 }
  0x31   :  { %1170 = vmatmul.msk.bf16.gmra.mxu0 %vm120_vm0, %v1218_v7 }
  0x41   :  { %1171 = vmatmul.msk.bf16.gmra.mxu0 %vm120_vm0, %v1219_v9 }
  0x51   :  { %1172 = vmatmul.msk.bf16.gmra.mxu0 %vm120_vm0, %v1220_v10 }
  0x61   :  { %1173 = vmatmul.msk.bf16.gmra.mxu0 %vm120_vm0, %v1221_v11 }
  0x8e   :  { %v154_v14 = vpop.f32.mrf.mxu0 }
  0x8f   :  { %v155_v19 = vadd.f32 %v1502_v16, %v154_v14 }
  0x91   :  { %v194_v25 = vmax.f32 %v155_v19, 0.0 }
  0x93   :  { %v1514_v33 = vmul.f32 %v1238_v26, %v194_v25 }
  0x94   :  { %v184_v1 = vpop.f32.mrf.mxu2 }
  0x95   :  { %v310_v39 = vrot.slane %v1514_v33, 3  ;;  %v258_v40 = vrot.slane %v1514_v33, 1  ;;  %v285_v55 = vrot.slane %v1514_v33, 2 }
  0x96   :  { %v156_v15 = vpop.f32.mrf.mxu0 }
  0x97   :  { %v157_v18 = vadd.f32 %v1502_v16, %v156_v15 }
  0x99   :  { %v195_v23 = vmax.f32 %v157_v18, 0.0 }
  0x9b   :  { %v243_v30 = vmul.f32 %v1239_v24, %v195_v23 }
  0x9c   :  { %v186_v20 = vpop.f32.mrf.mxu2 }
  0x9d   :  { %v318_v37 = vrot.slane %v243_v30, 3  ;;  %v266_v38 = vrot.slane %v243_v30, 1  ;;  %v293_v53 = vrot.slane %v243_v30, 2 }
  0x9e   :  { %v159_v17 = vpop.f32.mrf.mxu0 }
  0x9f   :  { %v160_v21 = vadd.f32 %v1502_v16, %v159_v17  ;;  %v327_v46 = vsel %vm326_vm1, %v310_v39, %v318_v37  ;;  %v277_v48 = vsel %vm276_vm2, %v258_v40, %v266_v38  ;;  %v302_v58 = vsel %vm301_vm3, %v285_v55, %v293_v53 }
  0xa1   :  { %v196_v27 = vmax.f32 %v160_v21, 0.0 }
  0xa3   :  { %v1516_v34 = vmul.f32 %v1242_v28, %v196_v27 }
  0xa4   :  { %v189_v40 = vpop.f32.mrf.mxu2 }
  0xa5   :  { %v311_v41 = vrot.slane %v1516_v34, 3  ;;  %v259_v43 = vrot.slane %v1516_v34, 1  ;;  %v286_v54 = vrot.slane %v1516_v34, 2 }
  0xa6   :  { %v161_v29 = vpop.f32.mrf.mxu0 }
  0xa7   :  { %v162_v31 = vadd.f32 %v1502_v16, %v161_v29 }
  0xa9   :  { %v197_v35 = vmax.f32 %v162_v31, 0.0 }
  0xab   :  { %v245_v36 = vmul.f32 %v1243_v32, %v197_v35 }
  0xac   :  { %v191_v53 = vpop.f32.mrf.mxu2 }
  0xad   :  { %v319_v42 = vrot.slane %v245_v36, 3  ;;  %v267_v44 = vrot.slane %v245_v36, 1  ;;  %v294_v52 = vrot.slane %v245_v36, 2  ;;  %v192_v63 = vadd.f32 %v1502_v16, %v191_v53 }
  0xae   :  { %v164_v45 = vpop.f32.mrf.mxu0 }
  0xaf   :  { %v328_v47 = vsel %vm326_vm1, %v311_v41, %v319_v42  ;;  %v278_v49 = vsel %vm276_vm2, %v259_v43, %v267_v44  ;;  %v303_v56 = vsel %vm301_vm3, %v286_v54, %v294_v52  ;;  %v165_v62 = vadd.f32 %v1502_v16, %v164_v45  ;;  %v1271_v54 = vld [vmem:[%s1889_s1 + $0x20] sm:$0xff]  }
  0xb0   :  { %v1293_v50 = vpack.i.bf16 %v328_v47, %v327_v46  ;;  %v1283_v51 = vpack.i.bf16 %v278_v49, %v277_v48  ;;  %v1288_v59 = vpack.i.bf16 %v303_v56, %v302_v58  ;;  %v1235_v46 = vld [vmem:[%s1893_s5 + $0x38] sm:$0xff]  ;;  %v187_v47 = vadd.f32 %v1502_v16, %v186_v20  ;;  %v1234_v48 = vld [vmem:[%s1893_s5 + $0x30] sm:$0xff] }
  0xb1   :  { %v198_v5 = vmax.f32 %v165_v62, 0.0  ;;  %529 = vmatpush.bf16.msra.mxu1 %v1235_v46  ;;  %v1273_v49 = vld [vmem:[%s1889_s1 + $0x30] sm:$0xff]   ;;  %v185_v56 = vadd.f32 %v1502_v16, %v184_v1  ;;  %v1255_v62 = vunpack.c.h.bf16 %v1271_v54  ;;  %v1254_v2 = vunpack.c.l.bf16 %v1271_v54  ;;  %v1274_v1 = vld [vmem:[%s1889_s1 + $0x38] sm:$0xff]  }
  0xb2   :  { %1294 = vrot.lane.b32.xlu1 %v1293_v50, %s1406_s4  ;;  %1284 = vrot.lane.b32.xlu0 %v1283_v51, %s1407_s29  ;;  %v1263_v58 = vunpack.c.h.bf16 %v1273_v49 }
  0xb3   :  { %v1552_v14 = vmul.f32 %v1246_v6, %v198_v5  ;;  %v206_v6 = vmax.f32 %v185_v56, 0.0 }
  0xb5   :  { %v287_v22 = vrot.slane %v1552_v14, 2  ;;  %v260_v23 = vrot.slane %v1552_v14, 1  ;;  %v312_v41 = vrot.slane %v1552_v14, 3  ;;  %530 = vmatpush.bf16.msra.mxu1 %v1234_v48 }
  0xb6   :  { %v166_v57 = vpop.f32.mrf.mxu0 }
  0xb7   :  { %v167_v61 = vadd.f32 %v1502_v16, %v166_v57  ;;  %v207_v57 = vmax.f32 %v187_v47, 0.0 }
  0xb9   :  { %v199_v3 = vmax.f32 %v167_v61, 0.0 }
  0xba   :  { %1289 = vrot.lane.b32.xlu0 %v1288_v59, %s1408_s30  ;;  %v1272_v59 = vld [vmem:[%s1889_s1 + $0x28] sm:$0xff]  }
  0xbb   :  { %v247_v10 = vmul.f32 %v1247_v4, %v199_v3  ;;  %v190_v3 = vadd.f32 %v1502_v16, %v189_v40  ;;  %v1258_v5 = vunpack.c.l.bf16 %v1272_v59 }
  0xbd   :  { %v268_v18 = vrot.slane %v247_v10, 1  ;;  %v295_v21 = vrot.slane %v247_v10, 2  ;;  %v320_v38 = vrot.slane %v247_v10, 3  ;;  %v208_v20 = vmax.f32 %v190_v3, 0.0 }
  0xbe   :  { %v169_v60 = vpop.f32.mrf.mxu0 }
  0xbf   :  { %v170_v0 = vadd.f32 %v1502_v16, %v169_v60  ;;  %v304_v29 = vsel %vm301_vm3, %v287_v22, %v295_v21  ;;  %v279_v31 = vsel %vm276_vm2, %v260_v23, %v268_v18  ;;  %v329_v44 = vsel %vm326_vm1, %v312_v41, %v320_v38  ;;  %v1233_v60 = vld [vmem:[%s1893_s5 + $0x28] sm:$0xff] }
  0xc0   :  { %531 = vmatpush.bf16.msra.mxu1 %v1233_v60  ;;  %v1259_v22 = vunpack.c.h.bf16 %v1272_v59 }
  0xc1   :  { %v200_v7 = vmax.f32 %v170_v0, 0.0 }
  0xc3   :  { %v1554_v15 = vmul.f32 %v1250_v8, %v200_v7  ;;  %v1262_v7 = vunpack.c.l.bf16 %v1273_v49  ;;  %v1605_v8 = vmul.f32 %v1263_v58, %v207_v57 }
  0xc5   :  { %v288_v25 = vrot.slane %v1554_v15, 2  ;;  %v261_v27 = vrot.slane %v1554_v15, 1  ;;  %v313_v39 = vrot.slane %v1554_v15, 3  ;;  %v272_v60 = vrot.slane %v1605_v8, 1 }
  0xc6   :  { %v171_v9 = vpop.f32.mrf.mxu0 }
  0xc7   :  { %v172_v11 = vadd.f32 %v1502_v16, %v171_v9  ;;  %v1232_v9 = vld [vmem:[%s1893_s5 + $0x20] sm:$0xff] }
  0xc8   :  { %532 = vmatpush.bf16.msra.mxu1 %v1232_v9  ;;  %v1230_v9 = vld [vmem:[%s1893_s5 + $0x10] sm:$0xff] }
  0xc9   :  { %v201_v17 = vmax.f32 %v172_v11, 0.0  ;;  %v1266_v11 = vunpack.c.l.bf16 %v1274_v1 }
  0xcb   :  { %v249_v19 = vmul.f32 %v1251_v12, %v201_v17  ;;  %v209_v12 = vmax.f32 %v192_v63, 0.0  ;;  %v1267_v17 = vunpack.c.h.bf16 %v1274_v1 }
  0xcd   :  { %v269_v24 = vrot.slane %v249_v19, 1  ;;  %v296_v26 = vrot.slane %v249_v19, 2  ;;  %v321_v37 = vrot.slane %v249_v19, 3 }
  0xce   :  { %v174_v28 = vpop.f32.mrf.mxu0 }
  0xcf   :  { %v305_v30 = vsel %vm301_vm3, %v288_v25, %v296_v26  ;;  %v280_v32 = vsel %vm276_vm2, %v261_v27, %v269_v24  ;;  %v330_v42 = vsel %vm326_vm1, %v313_v39, %v321_v37  ;;  %v175_v52 = vadd.f32 %v1502_v16, %v174_v28  ;;  %v1231_v26 = vld [vmem:[%s1893_s5 + $0x18] sm:$0xff] }
  0xd0   :  { %v1303_v35 = vpack.i.bf16 %v305_v30, %v304_v29  ;;  %v1298_v36 = vpack.i.bf16 %v280_v32, %v279_v31  ;;  %v1308_v45 = vpack.i.bf16 %v330_v42, %v329_v44  ;;  %v1615_v24 = vmul.f32 %v1262_v7, %v206_v6  ;;  %533 = vmatpush.bf16.msra.mxu1 %v1231_v26 }
  0xd1   :  { %v202_v0 = vmax.f32 %v175_v52, 0.0  ;;  %v299_v27 = vrot.slane %v1605_v8, 2  ;;  %v257_v30 = vmul.f32 %v1267_v17, %v209_v12  ;;  %v1621_v32 = vmul.f32 %v1266_v11, %v208_v20 }
  0xd2   :  { %1304 = vrot.lane.b32.xlu2 %v1303_v35, %s1408_s30  ;;  %1299 = vrot.lane.b32.xlu1 %v1298_v36, %s1407_s29  ;;  %v324_v44 = vrot.slane %v1605_v8, 3  ;;  %v316_v56 = vrot.slane %v1615_v24, 3  ;;  %v291_v58 = vrot.slane %v1615_v24, 2 }
  0xd3   :  { %v1610_v19 = vmul.f32 %v1254_v2, %v202_v0  ;;  %v325_v52 = vrot.slane %v257_v30, 3  ;;  %v317_v57 = vrot.slane %v1621_v32, 3  ;;  %v292_v59 = vrot.slane %v1621_v32, 2 }
  0xd4   :  { %v265_v63 = vrot.slane %v1621_v32, 1  ;;  %v333_v0 = vsel %vm326_vm1, %v316_v56, %v324_v44  ;;  %v308_v3 = vsel %vm301_vm3, %v291_v58, %v299_v27  ;;  %534 = vmatpush.bf16.msra.mxu1 %v1230_v9 }
  0xd5   :  { %v314_v35 = vrot.slane %v1610_v19, 3  ;;  %v289_v37 = vrot.slane %v1610_v19, 2  ;;  %v262_v39 = vrot.slane %v1610_v19, 1  ;;  %v334_v2 = vsel %vm326_vm1, %v317_v57, %v325_v52 }
  0xd6   :  { %v176_v43 = vpop.f32.mrf.mxu0  ;;  %v1338_v6 = vpack.i.bf16 %v334_v2, %v333_v0 }
  0xd7   :  { %v177_v50 = vadd.f32 %v1502_v16, %v176_v43 }
  0xd9   :  { %v203_v61 = vmax.f32 %v177_v50, 0.0 }
  0xda   :  { %1309 = vrot.lane.b32.xlu2 %v1308_v45, %s1406_s4  ;;  %v300_v45 = vrot.slane %v257_v30, 2 }
  0xdb   :  { %v251_v10 = vmul.f32 %v1255_v62, %v203_v61  ;;  %v273_v61 = vrot.slane %v257_v30, 1  ;;  %v264_v62 = vrot.slane %v1615_v24, 1 }
  0xdc   :  { %v309_v1 = vsel %vm301_vm3, %v292_v59, %v300_v45 }
  0xdd   :  { %v297_v28 = vrot.slane %v251_v10, 2  ;;  %v322_v29 = vrot.slane %v251_v10, 3  ;;  %v270_v31 = vrot.slane %v251_v10, 1  ;;  %v1333_v7 = vpack.i.bf16 %v309_v1, %v308_v3  ;;  %v1229_v10 = vld [vmem:[%s1893_s5 + $0x8] sm:$0xff] }
  0xde   :  { %v179_v51 = vpop.f32.mrf.mxu0  ;;  %535 = vmatpush.bf16.msra.mxu1 %v1229_v10 }
  0xdf   :  { %v180_v55 = vadd.f32 %v1502_v16, %v179_v51  ;;  %v331_v46 = vsel %vm326_vm1, %v314_v35, %v322_v29  ;;  %v306_v47 = vsel %vm301_vm3, %v289_v37, %v297_v28  ;;  %v281_v50 = vsel %vm276_vm2, %v262_v39, %v270_v31 }
  0xe1   :  { %v204_v4 = vmax.f32 %v180_v55, 0.0 }
  0xe2   :  { %536 = vmatpush.bf16.msra.mxu1 %v1228_v13 }
  0xe3   :  { %v1613_v23 = vmul.f32 %v1258_v5, %v204_v4  ;;  %v283_v4 = vsel %vm276_vm2, %v264_v62, %v272_v60  ;;  %v284_v5 = vsel %vm276_vm2, %v265_v63, %v273_v61 }
  0xe4   :  { %v1328_v8 = vpack.i.bf16 %v284_v5, %v283_v4 }
  0xe5   :  { %v315_v36 = vrot.slane %v1613_v23, 3  ;;  %v290_v38 = vrot.slane %v1613_v23, 2  ;;  %v263_v43 = vrot.slane %v1613_v23, 1 }
  0xe6   :  { %v181_v18 = vpop.f32.mrf.mxu0 }
  0xe7   :  { %v182_v21 = vadd.f32 %v1502_v16, %v181_v18 }
  0xe9   :  { %v205_v25 = vmax.f32 %v182_v21, 0.0 }
  0xeb   :  { %v253_v16 = vmul.f32 %v1259_v22, %v205_v25 }
  0xed   :  { %v271_v40 = vrot.slane %v253_v16, 1  ;;  %v298_v41 = vrot.slane %v253_v16, 2  ;;  %v323_v42 = vrot.slane %v253_v16, 3 }
  0xef   :  { %v332_v48 = vsel %vm326_vm1, %v315_v36, %v323_v42  ;;  %v307_v49 = vsel %vm301_vm3, %v290_v38, %v298_v41  ;;  %v282_v51 = vsel %vm276_vm2, %v263_v43, %v271_v40 }
  0xf0   :  { %v1323_v53 = vpack.i.bf16 %v332_v48, %v331_v46  ;;  %v1318_v54 = vpack.i.bf16 %v307_v49, %v306_v47  ;;  %v1313_v55 = vpack.i.bf16 %v282_v51, %v281_v50 }
  0xf2   :  { %1324 = vrot.lane.b32.xlu2 %v1323_v53, %s1406_s4  ;;  %1319 = vrot.lane.b32.xlu1 %v1318_v54, %s1408_s30 }
  0xf3   :  { %1314 = vrot.lane.b32.xlu0 %v1313_v55, %s1407_s29 }
  0xfa   :  { %1339 = vrot.lane.b32.xlu2 %v1338_v6, %s1406_s4  ;;  %1334 = vrot.lane.b32.xlu1 %v1333_v7, %s1408_s30 }
  0xfb   :  { %1329 = vrot.lane.b32.xlu0 %v1328_v8, %s1407_s29 }
 0x124   :  { %v1285_v11 = vpop.permute.xlu0 %1284  ;;  %v1295_v18 = vpop.permute.xlu1 %1294 }
 0x125   :  { %v1287_v12 = vunpack.i.h.bf16 %v1285_v11  ;;  %v1286_v17 = vunpack.i.l.bf16 %v1285_v11  ;;  %v1297_v25 = vunpack.i.h.bf16 %v1295_v18  ;;  %v1296_v26 = vunpack.i.l.bf16 %v1295_v18 }
 0x127   :  { %v433_v27 = vsel %vm431_vm4, %v1516_v34, %v1287_v12  ;;  %v432_v28 = vsel %vm431_vm4, %v1514_v33, %v1286_v17 }
 0x12c   :  { %v1290_v20 = vpop.permute.xlu0 %1289  ;;  %v1305_v36 = vpop.permute.xlu2 %1304 }
 0x12d   :  { %v1292_v21 = vunpack.i.h.bf16 %v1290_v20  ;;  %v1291_v22 = vunpack.i.l.bf16 %v1290_v20  ;;  %v1307_v41 = vunpack.i.h.bf16 %v1305_v36  ;;  %v1306_v34 = vunpack.i.l.bf16 %v1305_v36 }
 0x12f   :  { %v440_v29 = vsel %vm120_vm0, %v432_v28, %v1291_v22  ;;  %v441_v30 = vsel %vm120_vm0, %v433_v27, %v1292_v21 }
 0x130   :  { %v449_v31 = vsel %vm448_vm5, %v440_v29, %v1296_v26  ;;  %v450_v16 = vsel %vm448_vm5, %v441_v30, %v1297_v25 }
 0x131   :  { %v457_v35 = vpack.c.bf16 %v450_v16, %v449_v31 }
 0x133   :  { %537 = vmatmul.bf16.vlgmr.msra.gmra.mxu1 %v457_v35 }
 0x134   :  { %v1310_v37 = vpop.permute.xlu2 %1309 }
 0x135   :  { %v1312_v42 = vunpack.i.h.bf16 %v1310_v37  ;;  %v1311_v43 = vunpack.i.l.bf16 %v1310_v37 }
 0x144   :  { %v1300_v38 = vpop.permute.xlu1 %1299 }
 0x145   :  { %v1302_v39 = vunpack.i.h.bf16 %v1300_v38  ;;  %v1301_v40 = vunpack.i.l.bf16 %v1300_v38 }
 0x147   :  { %v435_v33 = vsel %vm431_vm4, %v1554_v15, %v1302_v39  ;;  %v434_v44 = vsel %vm431_vm4, %v1552_v14, %v1301_v40 }
 0x148   :  { %v442_v45 = vsel %vm120_vm0, %v434_v44, %v1306_v34  ;;  %v443_v46 = vsel %vm120_vm0, %v435_v33, %v1307_v41 }
 0x149   :  { %v451_v47 = vsel %vm448_vm5, %v442_v45, %v1311_v43  ;;  %v452_v48 = vsel %vm448_vm5, %v443_v46, %v1312_v42 }
 0x14a   :  { %v458_v49 = vpack.c.bf16 %v452_v48, %v451_v47 }
 0x14c   :  { %542 = vmatmul.bf16.gmra.mxu1 %v458_v49  ;;  %v1325_v51 = vpop.permute.xlu2 %1324 }
 0x14d   :  { %v1327_v56 = vunpack.i.h.bf16 %v1325_v51  ;;  %v1326_v57 = vunpack.i.l.bf16 %v1325_v51  ;;  %v1762_v51 = vld [vmem:[%s1890_s2] sm:$0xff]  ;;  %s1409_s2 = smov [#allocation2]  }
 0x14e   :  { %s1109_s30 = sshll.u32 %s1409_s2, 4  ;;  %s1110_s30 = int_to_ptr.vmem [resolvable:$true] %s1109_s30 }
 0x154   :  { %v1340_v6 = vpop.permute.xlu2 %1339 }
 0x155   :  { %v1342_v9 = vunpack.i.h.bf16 %v1340_v6  ;;  %v1341_v10 = vunpack.i.l.bf16 %v1340_v6 }
 0x164   :  { %v1320_v50 = vpop.permute.xlu1 %1319 }
 0x165   :  { %v1322_v52 = vunpack.i.h.bf16 %v1320_v50  ;;  %v1321_v53 = vunpack.i.l.bf16 %v1320_v50  ;;  %v1315_v54 = vpop.permute.xlu0 %1314 }
 0x166   :  { %v1317_v55 = vunpack.i.h.bf16 %v1315_v54  ;;  %v1316_v15 = vunpack.i.l.bf16 %v1315_v54  ;;  %v696_v54 = vrot.slane %v1762_v51, 1 }
 0x168   :  { %v437_v14 = vsel %vm431_vm4, %v1613_v23, %v1317_v55  ;;  %v436_v58 = vsel %vm431_vm4, %v1610_v19, %v1316_v15  ;;  %v711_v15 = vsub.f32 1.0, %v696_v54 }
 0x169   :  { %v444_v59 = vsel %vm120_vm0, %v436_v58, %v1321_v53  ;;  %v445_v60 = vsel %vm120_vm0, %v437_v14, %v1322_v52  ;;  %v710_v52 = vsub.f32 1.0, %v1762_v51 }
 0x16a   :  { %v453_v61 = vsel %vm448_vm5, %v444_v59, %v1326_v57  ;;  %v454_v62 = vsel %vm448_vm5, %v445_v60, %v1327_v56  ;;  %v719_v14 = vmul.f32 1e+09, %v711_v15 }
 0x16b   :  { %v459_v63 = vpack.c.bf16 %v454_v62, %v453_v61  ;;  %v718_v53 = vmul.f32 1e+09, %v710_v52 }
 0x16c   :  { %v1335_v2 = vpop.permute.xlu1 %1334  ;;  %v735_v59 = vperm.slane %v719_v14, 0 }
 0x16d   :  { %v1330_v0 = vpop.permute.xlu0 %1329  ;;  %547 = vmatmul.bf16.gmra.mxu1 %v459_v63  ;;  %v1337_v4 = vunpack.i.h.bf16 %v1335_v2  ;;  %v1336_v5 = vunpack.i.l.bf16 %v1335_v2  ;;  %v734_v55 = vperm.slane %v718_v53, 0  ;;  %v697_v63 = vrot.slane %v1762_v51, 2 }
 0x16e   :  { %v1332_v3 = vunpack.i.h.bf16 %v1330_v0  ;;  %v1331_v1 = vunpack.i.l.bf16 %v1330_v0 }
 0x16f   :  { %v712_v2 = vsub.f32 1.0, %v697_v63  ;;  %v847_v63 = vperm.slane %v1762_v51, 0 }
 0x170   :  { %v439_v23 = vsel %vm431_vm4, %v1621_v32, %v1332_v3  ;;  %v438_v19 = vsel %vm431_vm4, %v1615_v24, %v1331_v1  ;;  %v1347_v32 = vld [vmem:[%s1894_s6] ss:$0 sm:$0xff] }
 0x171   :  { %v446_v7 = vsel %vm120_vm0, %v438_v19, %v1336_v5  ;;  %v447_v8 = vsel %vm120_vm0, %v439_v23, %v1337_v4  ;;  %v720_v1 = vmul.f32 1e+09, %v712_v2  ;;  %v698_v4 = vrot.slane %v1762_v51, 3 }
 0x172   :  { %v455_v13 = vsel %vm448_vm5, %v446_v7, %v1341_v10  ;;  %v456_v11 = vsel %vm448_vm5, %v447_v8, %v1342_v9 }
 0x173   :  { %v460_v12 = vpack.c.bf16 %v456_v11, %v455_v13  ;;  %v736_v5 = vperm.slane %v720_v1, 0  ;;  %v713_v23 = vsub.f32 1.0, %v698_v4 }
 0x175   :  { %v721_v7 = vmul.f32 1e+09, %v713_v23 }
 0x177   :  { %v737_v9 = vperm.slane %v721_v7, 0 }
 0x17d   :  { %552 = vmatmul.bf16.gmra.mxu1 %v460_v12 }
 0x1b0   :  { %v538_v17 = vpop.f32.mrf.mxu1 }
 0x1b1   :  { %v1711_v18 = vadd.f32 %v1347_v32, %v538_v17  ;;  %v699_v17 = vrot.slane %v1762_v51, 4 }
 0x1b3   :  { %v559_v24 = vpack.c.bf16 %v1711_v18, %v1711_v18 }
 0x1b5   :  { %v568_v20 = vsel %vm431_vm4, %v559_v24, 0 }
 0x1b6   :  { %577 = vmatpush.bf16.xpose.msrb.mxu2 %v568_v20 }
 0x1b8   :  { %v540_v21 = vpop.f32.mrf.mxu1 }
 0x1b9   :  { %v1716_v22 = vadd.f32 %v1347_v32, %v540_v21  ;;  %v700_v21 = vrot.slane %v1762_v51, 5 }
 0x1bb   :  { %v560_v25 = vpack.c.bf16 %v1716_v22, %v1716_v22 }
 0x1bd   :  { %1208 = vmatmul.msk.bf16.vlgmr.msrb.gmra.mxu2 %vm431_vm4, %v559_v24  ;;  %v584_v26 = vsel %vm431_vm4, %v560_v25, 0  ;;  %v714_v24 = vsub.f32 1.0, %v699_v17 }
 0x1be   :  { %593 = vmatpush.bf16.xpose.msra.mxu3 %v584_v26  ;;  %v715_v26 = vsub.f32 1.0, %v700_v21 }
 0x1bf   :  { %v722_v20 = vmul.f32 1e+09, %v714_v24 }
 0x1c5   :  { %1209 = vmatmul.msk.bf16.vlgmr.msra.gmra.mxu3 %vm431_vm4, %v560_v25  ;;  %v738_v25 = vperm.slane %v722_v20, 0 }
 0x1c9   :  { %v543_v27 = vpop.f32.mrf.mxu1 }
 0x1ca   :  { %v1723_v28 = vadd.f32 %v1347_v32, %v543_v27 }
 0x1cc   :  { %v561_v29 = vpack.c.bf16 %v1723_v28, %v1723_v28 }
 0x1ce   :  { %v600_v30 = vsel %vm431_vm4, %v561_v29, 0 }
 0x1cf   :  { %609 = vmatpush.bf16.xpose.msra.mxu2 %v600_v30  ;;  %v723_v30 = vmul.f32 1e+09, %v715_v26 }
 0x1d1   :  { %v545_v31 = vpop.f32.mrf.mxu1 }
 0x1d2   :  { %v1728_v16 = vadd.f32 %v1347_v32, %v545_v31  ;;  %v701_v31 = vrot.slane %v1762_v51, 6 }
 0x1d4   :  { %v562_v35 = vpack.c.bf16 %v1728_v16, %v1728_v16 }
 0x1d6   :  { %1210 = vmatmul.msk.bf16.vlgmr.msra.gmra.mxu2 %vm431_vm4, %v561_v29  ;;  %v616_v36 = vsel %vm431_vm4, %v562_v35, 0 }
 0x1d7   :  { %625 = vmatpush.bf16.xpose.msrb.mxu3 %v616_v36  ;;  %v739_v36 = vperm.slane %v723_v30, 0 }
 0x1de   :  { %1211 = vmatmul.msk.bf16.vlgmr.msrb.gmra.mxu3 %vm431_vm4, %v562_v35 }
 0x1ea   :  { %v548_v37 = vpop.f32.mrf.mxu1 }
 0x1eb   :  { %v1735_v38 = vadd.f32 %v1347_v32, %v548_v37  ;;  %v716_v37 = vsub.f32 1.0, %v701_v31 }
 0x1ed   :  { %v563_v39 = vpack.c.bf16 %v1735_v38, %v1735_v38 }
 0x1ef   :  { %v632_v40 = vsel %vm431_vm4, %v563_v39, 0 }
 0x1f0   :  { %641 = vmatpush.bf16.xpose.msrb.mxu2 %v632_v40 }
 0x1f2   :  { %v550_v41 = vpop.f32.mrf.mxu1 }
 0x1f3   :  { %v1740_v34 = vadd.f32 %v1347_v32, %v550_v41 }
 0x1f5   :  { %v564_v42 = vpack.c.bf16 %v1740_v34, %v1740_v34 }
 0x1f7   :  { %1212 = vmatmul.msk.bf16.vlgmr.msrb.gmra.mxu2 %vm431_vm4, %v563_v39  ;;  %v648_v43 = vsel %vm431_vm4, %v564_v42, 0 }
 0x1f8   :  { %657 = vmatpush.bf16.xpose.msra.mxu3 %v648_v43  ;;  %v702_v43 = vrot.slane %v1762_v51, 7 }
 0x1fa   :  { %v553_v33 = vpop.f32.mrf.mxu1 }
 0x1fb   :  { %v1746_v44 = vadd.f32 %v1347_v32, %v553_v33 }
 0x1fd   :  { %v565_v45 = vpack.c.bf16 %v1746_v44, %v1746_v44 }
 0x1ff   :  { %1213 = vmatmul.msk.bf16.vlgmr.msra.gmra.mxu3 %vm431_vm4, %v564_v42  ;;  %v664_v46 = vsel %vm431_vm4, %v565_v45, 0  ;;  %v724_v42 = vmul.f32 1e+09, %v716_v37 }
 0x200   :  { %673 = vmatpush.bf16.xpose.msra.mxu2 %v664_v46  ;;  %v717_v46 = vsub.f32 1.0, %v702_v43 }
 0x202   :  { %v555_v47 = vpop.f32.mrf.mxu1  ;;  %v725_v52 = vmul.f32 1e+09, %v717_v46 }
 0x203   :  { %v1752_v48 = vadd.f32 %v1347_v32, %v555_v47 }
 0x204   :  { %v741_v54 = vperm.slane %v725_v52, 0  ;;  %v889_v52 = vperm.slane %v1762_v51, 6 }
 0x205   :  { %v566_v49 = vpack.c.bf16 %v1752_v48, %v1752_v48 }
 0x207   :  { %1214 = vmatmul.msk.bf16.vlgmr.msra.gmra.mxu2 %vm431_vm4, %v565_v45  ;;  %v680_v50 = vsel %vm431_vm4, %v566_v49, 0  ;;  %v740_v45 = vperm.slane %v724_v42, 0 }
 0x208   :  { %689 = vmatpush.bf16.xpose.msrb.mxu3 %v680_v50 }
 0x20f   :  { %1215 = vmatmul.msk.bf16.vlgmr.msrb.gmra.mxu3 %vm431_vm4, %v566_v49 }
 0x240   :  { %v579_v56 = vpop.f32.mrf.mxu2 }
 0x241   :  { %v1766_v57 = vsub.f32 %v579_v56, %v734_v55 }
 0x243   :  { %v759_v58 = vsel %vm758_vm6, %v1766_v57, -inf }
 0x244   :  { %760 = vmax.xlane.f32.xlu0 %v759_v58 }
 0x248   :  { %v581_v60 = vpop.f32.mrf.mxu2  ;;  %v595_v61 = vpop.f32.mrf.mxu3 }
 0x249   :  { %v1770_v62 = vsub.f32 %v595_v61, %v735_v59  ;;  %v854_v59 = vperm.slane %v1762_v51, 1  ;;  %v861_v60 = vperm.slane %v1762_v51, 2  ;;  %v868_v61 = vperm.slane %v1762_v51, 3 }
 0x24b   :  { %v762_v0 = vsel %vm758_vm6, %v1770_v62, -inf }
 0x24c   :  { %763 = vmax.xlane.f32.xlu1 %v762_v0  ;;  %v875_v0 = vperm.slane %v1762_v51, 4 }
 0x250   :  { %v597_v3 = vpop.f32.mrf.mxu3 }
 0x259   :  { %v611_v19 = vpop.f32.mrf.mxu2 }
 0x25a   :  { %v1776_v6 = vsub.f32 %v611_v19, %v736_v5 }
 0x25c   :  { %v765_v8 = vsel %vm758_vm6, %v1776_v6, -inf }
 0x25d   :  { %766 = vmax.xlane.f32.xlu2 %v765_v8 }
 0x261   :  { %v613_v10 = vpop.f32.mrf.mxu2  ;;  %v627_v13 = vpop.f32.mrf.mxu3 }
 0x262   :  { %v1780_v11 = vsub.f32 %v627_v13, %v737_v9 }
 0x264   :  { %v768_v12 = vsel %vm758_vm6, %v1780_v11, -inf }
 0x265   :  { %769 = vmax.xlane.f32.xlu2 %v768_v12 }
 0x269   :  { %v629_v32 = vpop.f32.mrf.mxu3 }
 0x27a   :  { %v643_v27 = vpop.f32.mrf.mxu2 }
 0x27b   :  { %v1786_v29 = vsub.f32 %v643_v27, %v738_v25 }
 0x27d   :  { %v771_v35 = vsel %vm758_vm6, %v1786_v29, -inf }
 0x27e   :  { %772 = vmax.xlane.f32.xlu0 %v771_v35 }
 0x282   :  { %v645_v39 = vpop.f32.mrf.mxu2  ;;  %v659_v40 = vpop.f32.mrf.mxu3 }
 0x283   :  { %v1791_v41 = vsub.f32 %v659_v40, %v739_v36 }
 0x285   :  { %v774_v33 = vsel %vm758_vm6, %v1791_v41, -inf }
 0x286   :  { %775 = vmax.xlane.f32.xlu1 %v774_v33 }
 0x28a   :  { %v661_v47 = vpop.f32.mrf.mxu3  ;;  %v675_v49 = vpop.f32.mrf.mxu2 }
 0x28b   :  { %v1796_v50 = vsub.f32 %v675_v49, %v740_v45  ;;  %v896_v49 = vperm.slane %v1762_v51, 7 }
 0x28d   :  { %v777_v53 = vsel %vm758_vm6, %v1796_v50, -inf }
 0x28e   :  { %778 = vmax.xlane.f32.xlu2 %v777_v53 }
 0x292   :  { %v677_v55 = vpop.f32.mrf.mxu2  ;;  %v691_v15 = vpop.f32.mrf.mxu3 }
 0x293   :  { %v1800_v56 = vsub.f32 %v691_v15, %v741_v54 }
 0x295   :  { %v780_v14 = vsel %vm758_vm6, %v1800_v56, -inf }
 0x296   :  { %781 = vmax.xlane.f32.xlu0 %v780_v14 }
 0x29a   :  { %v693_v58 = vpop.f32.mrf.mxu3 }
 0x29f   :  { %859 = vperm.xlu1 %1344, %v854_v59  }
 0x2a6   :  { %866 = vperm.xlu2 %1345, %v861_v60  }
 0x2a7   :  { %873 = vperm.xlu1 %1344, %v868_v61  }
 0x2aa   :  { %852 = vperm.xlu0 %1343, %v847_v63  }
 0x2ae   :  { %880 = vperm.xlu2 %1345, %v875_v0  }
 0x2b7   :  { %v761_v2 = vpop.xlane.xlu0 %760 }
 0x2b8   :  { %v783_v3 = vsub.f32 %v1766_v57, %v761_v2 }
 0x2ba   :  { %v791_v4 = vmul.f32 1.442695, %v783_v3 }
 0x2bc   :  { %1348 = vpow2.f32 %v791_v4 }
 0x2bf   :  { %v764_v1 = vpop.xlane.xlu1 %763 }
 0x2c0   :  { %v784_v5 = vsub.f32 %v1770_v62, %v764_v1 }
 0x2c2   :  { %v793_v23 = vmul.f32 1.442695, %v784_v5  ;;  %v1811_v19 = vpop.eup %1348 }
 0x2c3   :  { %v807_v7 = vsel %vm758_vm6, %v1811_v19, 0.0 }
 0x2c4   :  { %1350 = vpow2.f32 %v793_v23 }
 0x2ca   :  { %v1816_v10 = vpop.eup %1350 }
 0x2cb   :  { %v810_v57 = vsel %vm758_vm6, %v1816_v10, 0.0 }
 0x2d0   :  { %v767_v8 = vpop.xlane.xlu2 %766 }
 0x2d1   :  { %808 = vadd.xlane.f32.xlu1 %v807_v7  ;;  %v785_v9 = vsub.f32 %v1776_v6, %v767_v8 }
 0x2d3   :  { %v795_v13 = vmul.f32 1.442695, %v785_v9 }
 0x2d5   :  { %1352 = vpow2.f32 %v795_v13 }
 0x2d7   :  { %811 = vadd.xlane.f32.xlu2 %v810_v57 }
 0x2d8   :  { %v770_v62 = vpop.xlane.xlu2 %769 }
 0x2d9   :  { %v786_v12 = vsub.f32 %v1780_v11, %v770_v62 }
 0x2db   :  { %v1821_v32 = vpop.eup %1352  ;;  %v797_v17 = vmul.f32 1.442695, %v786_v12 }
 0x2dc   :  { %v813_v24 = vsel %vm758_vm6, %v1821_v32, 0.0 }
 0x2dd   :  { %1354 = vpow2.f32 %v797_v17  ;;  %814 = vadd.xlane.f32.xlu0 %v813_v24 }
 0x2e3   :  { %v1825_v6 = vpop.eup %1354 }
 0x2e4   :  { %v816_v20 = vsel %vm758_vm6, %v1825_v6, 0.0 }
 0x2e5   :  { %817 = vadd.xlane.f32.xlu1 %v816_v20 }
 0x2f1   :  { %v773_v21 = vpop.xlane.xlu0 %772 }
 0x2f2   :  { %v787_v25 = vsub.f32 %v1786_v29, %v773_v21 }
 0x2f4   :  { %v799_v26 = vmul.f32 1.442695, %v787_v25 }
 0x2f6   :  { %1356 = vpow2.f32 %v799_v26 }
 0x2f9   :  { %v776_v11 = vpop.xlane.xlu1 %775 }
 0x2fa   :  { %v788_v27 = vsub.f32 %v1791_v41, %v776_v11 }
 0x2fc   :  { %v1831_v30 = vpop.eup %1356  ;;  %v801_v31 = vmul.f32 1.442695, %v788_v27 }
 0x2fd   :  { %v819_v35 = vsel %vm758_vm6, %v1831_v30, 0.0 }
 0x2fe   :  { %1358 = vpow2.f32 %v801_v31  ;;  %820 = vadd.xlane.f32.xlu2 %v819_v35 }
 0x301   :  { %v779_v36 = vpop.xlane.xlu2 %778 }
 0x302   :  { %v789_v37 = vsub.f32 %v1796_v50, %v779_v36  ;;  %v882_v50 = vperm.slane %v1762_v51, 5 }
 0x304   :  { %v1836_v39 = vpop.eup %1358  ;;  %v803_v40 = vmul.f32 1.442695, %v789_v37 }
 0x305   :  { %v822_v29 = vsel %vm758_vm6, %v1836_v39, 0.0 }
 0x306   :  { %1360 = vpow2.f32 %v803_v40  ;;  %823 = vadd.xlane.f32.xlu0 %v822_v29 }
 0x309   :  { %v782_v41 = vpop.xlane.xlu0 %781  ;;  %v867_v54 = vpop.permute.xlu2 %866 }
 0x30a   :  { %v790_v42 = vsub.f32 %v1800_v56, %v782_v41 }
 0x30c   :  { %v1841_v43 = vpop.eup %1360  ;;  %v805_v33 = vmul.f32 1.442695, %v790_v42 }
 0x30d   :  { %v825_v45 = vsel %vm758_vm6, %v1841_v43, 0.0 }
 0x30e   :  { %1362 = vpow2.f32 %v805_v33  ;;  %826 = vadd.xlane.f32.xlu1 %v825_v45 }
 0x311   :  { %v860_v53 = vpop.permute.xlu1 %859  ;;  %v881_v15 = vpop.permute.xlu2 %880 }
 0x314   :  { %v1845_v46 = vpop.eup %1362 }
 0x315   :  { %v828_v47 = vsel %vm758_vm6, %v1845_v46, 0.0 }
 0x316   :  { %829 = vadd.xlane.f32.xlu2 %v828_v47 }
 0x319   :  { %v874_v55 = vpop.permute.xlu1 %873 }
 0x31a   :  { %901 = vperm.xlu0 %1343, %v896_v49  }
 0x31c   :  { %v853_v14 = vpop.permute.xlu0 %852 }
 0x327   :  { %887 = vperm.xlu1 %1344, %v882_v50  }
 0x32e   :  { %894 = vperm.xlu2 %1345, %v889_v52  }
 0x344   :  { %v809_v56 = vpop.xlane.xlu1 %808 }
 0x345   :  { %1364 = vrcp.f32 %v809_v56 }
 0x34a   :  { %v812_v58 = vpop.xlane.xlu2 %811 }
 0x34b   :  { %v1365_v59 = vpop.eup %1364  ;;  %1366 = vrcp.f32 %v812_v58 }
 0x34c   :  { %v839_v60 = vmul.f32 %v1365_v59, %v1811_v19 }
 0x34e   :  { %v903_v61 = vmul.f32 %v853_v14, %v839_v60 }
 0x350   :  { %v911_v63 = vsel %vm758_vm6, %v903_v61, 0.0  ;;  %v815_v0 = vpop.xlane.xlu0 %814 }
 0x351   :  { %v1367_v2 = vpop.eup %1366  ;;  %v912_v3 = vrot.slane %v911_v63, 4  ;;  %1368 = vrcp.f32 %v815_v0 }
 0x352   :  { %v840_v51 = vmul.f32 %v1367_v2, %v1816_v10 }
 0x353   :  { %v913_v1 = vadd.f32 %v912_v3, %v911_v63 }
 0x354   :  { %v904_v4 = vmul.f32 %v860_v53, %v840_v51 }
 0x355   :  { %v914_v5 = vrot.slane %v913_v1, 2 }
 0x356   :  { %v918_v23 = vsel %vm758_vm6, %v904_v4, 0.0 }
 0x357   :  { %v1369_v7 = vpop.eup %1368  ;;  %v915_v8 = vadd.f32 %v914_v5, %v913_v1  ;;  %v919_v9 = vrot.slane %v918_v23, 4 }
 0x358   :  { %v841_v13 = vmul.f32 %v1369_v7, %v1821_v32  ;;  %v818_v19 = vpop.xlane.xlu1 %817 }
 0x359   :  { %1370 = vrcp.f32 %v818_v19  ;;  %v916_v57 = vrot.slane %v915_v8, 1  ;;  %v920_v62 = vadd.f32 %v919_v9, %v918_v23 }
 0x35a   :  { %v905_v12 = vmul.f32 %v867_v54, %v841_v13 }
 0x35b   :  { %v917_v17 = vadd.f32 %v916_v57, %v915_v8  ;;  %v921_v24 = vrot.slane %v920_v62, 2 }
 0x35c   :  { %v925_v20 = vsel %vm758_vm6, %v905_v12, 0.0 }
 0x35d   :  { %971 = vperm.xlu1 %1344, %v917_v17   ;;  %v922_v10 = vadd.f32 %v921_v24, %v920_v62  ;;  %v926_v21 = vrot.slane %v925_v20, 4 }
 0x35f   :  { %v1371_v25 = vpop.eup %1370  ;;  %v923_v26 = vrot.slane %v922_v10, 1  ;;  %v927_v11 = vadd.f32 %v926_v21, %v925_v20 }
 0x360   :  { %v842_v27 = vmul.f32 %v1371_v25, %v1825_v6 }
 0x361   :  { %v924_v31 = vadd.f32 %v923_v26, %v922_v10  ;;  %v928_v35 = vrot.slane %v927_v11, 2 }
 0x362   :  { %v906_v32 = vmul.f32 %v874_v55, %v842_v27 }
 0x363   :  { %977 = vperm.xlu2 %1345, %v924_v31   ;;  %v929_v36 = vadd.f32 %v928_v35, %v927_v11 }
 0x364   :  { %v932_v37 = vsel %vm758_vm6, %v906_v32, 0.0 }
 0x365   :  { %v930_v40 = vrot.slane %v929_v36, 1  ;;  %v933_v29 = vrot.slane %v932_v37, 4 }
 0x367   :  { %v931_v41 = vadd.f32 %v930_v40, %v929_v36  ;;  %v934_v42 = vadd.f32 %v933_v29, %v932_v37 }
 0x369   :  { %983 = vperm.xlu0 %1343, %v931_v41   ;;  %v935_v33 = vrot.slane %v934_v42, 2 }
 0x36b   :  { %v936_v45 = vadd.f32 %v935_v33, %v934_v42 }
 0x36d   :  { %v937_v47 = vrot.slane %v936_v45, 1 }
 0x36f   :  { %v938_v49 = vadd.f32 %v937_v47, %v936_v45 }
 0x371   :  { %v821_v50 = vpop.xlane.xlu2 %820  ;;  %989 = vperm.xlu1 %1344, %v938_v49  }
 0x372   :  { %1372 = vrcp.f32 %v821_v50 }
 0x378   :  { %v1373_v6 = vpop.eup %1372 }
 0x379   :  { %v843_v52 = vmul.f32 %v1373_v6, %v1831_v30  ;;  %v824_v0 = vpop.xlane.xlu0 %823 }
 0x37b   :  { %v907_v53 = vmul.f32 %v881_v15, %v843_v52 }
 0x37d   :  { %v939_v54 = vsel %vm758_vm6, %v907_v53, 0.0 }
 0x37e   :  { %v940_v55 = vrot.slane %v939_v54, 4 }
 0x380   :  { %v941_v56 = vadd.f32 %v940_v55, %v939_v54 }
 0x381   :  { %v827_v58 = vpop.xlane.xlu1 %826 }
 0x382   :  { %v942_v14 = vrot.slane %v941_v56, 2  ;;  %1374 = vrcp.f32 %v827_v58 }
 0x384   :  { %v943_v59 = vadd.f32 %v942_v14, %v941_v56 }
 0x386   :  { %v944_v60 = vrot.slane %v943_v59, 1 }
 0x388   :  { %v945_v61 = vadd.f32 %v944_v60, %v943_v59  ;;  %v1375_v2 = vpop.eup %1374 }
 0x389   :  { %v830_v63 = vpop.xlane.xlu2 %829  ;;  %v845_v30 = vmul.f32 %v1375_v2, %v1841_v43 }
 0x38a   :  { %1376 = vrcp.f32 %v830_v63  ;;  %995 = vperm.xlu2 %1345, %v945_v61  }
 0x38b   :  { %1378 = vrcp.f32 %v824_v0 }
 0x38c   :  { %v902_v1 = vpop.permute.xlu0 %901 }
 0x390   :  { %v1377_v3 = vpop.eup %1376 }
 0x391   :  { %v846_v15 = vmul.f32 %v1377_v3, %v1845_v46  ;;  %v895_v51 = vpop.permute.xlu2 %894  ;;  %v1379_v7 = vpop.eup %1378 }
 0x392   :  { %v909_v4 = vmul.f32 %v895_v51, %v845_v30  ;;  %v844_v62 = vmul.f32 %v1379_v7, %v1836_v39 }
 0x393   :  { %v910_v5 = vmul.f32 %v902_v1, %v846_v15 }
 0x394   :  { %v953_v23 = vsel %vm758_vm6, %v909_v4, 0.0 }
 0x395   :  { %v960_v8 = vsel %vm758_vm6, %v910_v5, 0.0  ;;  %v954_v9 = vrot.slane %v953_v23, 4 }
 0x396   :  { %v961_v13 = vrot.slane %v960_v8, 4 }
 0x397   :  { %v955_v19 = vadd.f32 %v954_v9, %v953_v23 }
 0x398   :  { %v962_v57 = vadd.f32 %v961_v13, %v960_v8 }
 0x399   :  { %v956_v12 = vrot.slane %v955_v19, 2  ;;  %v888_v17 = vpop.permute.xlu1 %887 }
 0x39a   :  { %v963_v43 = vrot.slane %v962_v57, 2  ;;  %v908_v24 = vmul.f32 %v888_v17, %v844_v62 }
 0x39b   :  { %v957_v46 = vadd.f32 %v956_v12, %v955_v19 }
 0x39c   :  { %v964_v20 = vadd.f32 %v963_v43, %v962_v57  ;;  %v946_v10 = vsel %vm758_vm6, %v908_v24, 0.0 }
 0x39d   :  { %v947_v21 = vrot.slane %v946_v10, 4  ;;  %v958_v25 = vrot.slane %v957_v46, 1 }
 0x39e   :  { %v965_v26 = vrot.slane %v964_v20, 1 }
 0x39f   :  { %v948_v11 = vadd.f32 %v947_v21, %v946_v10  ;;  %v959_v27 = vadd.f32 %v958_v25, %v957_v46 }
 0x3a0   :  { %v966_v31 = vadd.f32 %v965_v26, %v964_v20 }
 0x3a1   :  { %v949_v35 = vrot.slane %v948_v11, 2  ;;  %1007 = vperm.xlu1 %1344, %v959_v27  }
 0x3a2   :  { %1013 = vperm.xlu2 %1345, %v966_v31  }
 0x3a3   :  { %v950_v32 = vadd.f32 %v949_v35, %v948_v11 }
 0x3a5   :  { %v951_v36 = vrot.slane %v950_v32, 1 }
 0x3a7   :  { %v952_v39 = vadd.f32 %v951_v36, %v950_v32 }
 0x3a9   :  { %1001 = vperm.xlu0 %1343, %v952_v39  }
 0x3bd   :  { %v978_v37 = vpop.permute.xlu2 %977 }
 0x3be   :  { %v1016_v47 = vmul.f32 %v978_v37, %v1716_v22 }
 0x3c0   :  { %v1030_v53 = vsel %vm431_vm4, %v1016_v47, 0.0 }
 0x3cf   :  { %v972_v40 = vpop.permute.xlu1 %971 }
 0x3d0   :  { %v1015_v33 = vmul.f32 %v972_v40, %v1711_v18  ;;  %v1031_v18 = vrot.slane %v1030_v53, 4 }
 0x3d2   :  { %v1023_v50 = vsel %vm431_vm4, %v1015_v33, 0.0  ;;  %v1032_v61 = vadd.f32 %v1031_v18, %v1030_v53 }
 0x3d3   :  { %v1024_v55 = vrot.slane %v1023_v50, 4 }
 0x3d4   :  { %v1033_v1 = vrot.slane %v1032_v61, 2 }
 0x3d6   :  { %v1034_v13 = vadd.f32 %v1033_v1, %v1032_v61 }
 0x3d8   :  { %v1035_v20 = vrot.slane %v1034_v13, 1 }
 0x3da   :  { %v1036_v32 = vadd.f32 %v1035_v20, %v1034_v13 }
 0x3db   :  { %v984_v29 = vpop.permute.xlu0 %983 }
 0x3dc   :  { %v1017_v45 = vmul.f32 %v984_v29, %v1723_v28 }
 0x3de   :  { %v1037_v6 = vsel %vm431_vm4, %v1017_v45, 0.0 }
 0x3df   :  { %v1038_v14 = vrot.slane %v1037_v6, 4 }
 0x3e1   :  { %v1039_v59 = vadd.f32 %v1038_v14, %v1037_v6 }
 0x3e3   :  { %v990_v41 = vpop.permute.xlu1 %989  ;;  %v1040_v30 = vrot.slane %v1039_v59, 2 }
 0x3e4   :  { %v996_v42 = vpop.permute.xlu2 %995  ;;  %v1018_v49 = vmul.f32 %v990_v41, %v1728_v16  ;;  %v1025_v16 = vadd.f32 %v1024_v55, %v1023_v50 }
 0x3e5   :  { %v1019_v52 = vmul.f32 %v996_v42, %v1735_v38  ;;  %v1041_v7 = vadd.f32 %v1040_v30, %v1039_v59 }
 0x3e6   :  { %v1044_v54 = vsel %vm431_vm4, %v1018_v49, 0.0  ;;  %v1026_v3 = vrot.slane %v1025_v16, 2 }
 0x3e7   :  { %v1045_v58 = vrot.slane %v1044_v54, 4  ;;  %v1051_v28 = vsel %vm431_vm4, %v1019_v52, 0.0  ;;  %v1042_v17 = vrot.slane %v1041_v7, 1 }
 0x3e8   :  { %v1052_v60 = vrot.slane %v1051_v28, 4 }
 0x3e9   :  { %v1046_v63 = vadd.f32 %v1045_v58, %v1044_v54  ;;  %v1043_v27 = vadd.f32 %v1042_v17, %v1041_v7 }
 0x3ea   :  { %v1053_v15 = vadd.f32 %v1052_v60, %v1051_v28 }
 0x3eb   :  { %v1047_v4 = vrot.slane %v1046_v63, 2 }
 0x3ec   :  { %v1054_v8 = vrot.slane %v1053_v15, 2 }
 0x3ed   :  { %v1048_v19 = vadd.f32 %v1047_v4, %v1046_v63 }
 0x3ee   :  { %v1055_v43 = vadd.f32 %v1054_v8, %v1053_v15 }
 0x3ef   :  { %v1049_v10 = vrot.slane %v1048_v19, 1 }
 0x3f0   :  { %v1056_v31 = vrot.slane %v1055_v43, 1 }
 0x3f1   :  { %v1050_v36 = vadd.f32 %v1049_v10, %v1048_v19 }
 0x3f2   :  { %v1057_v41 = vadd.f32 %v1056_v31, %v1055_v43 }
 0x3fc   :  { %v1014_v56 = vpop.permute.xlu2 %1013 }
 0x3fd   :  { %v1022_v22 = vmul.f32 %v1014_v56, %v1752_v48  ;;  %v1027_v48 = vadd.f32 %v1026_v3, %v1025_v16 }
 0x3ff   :  { %v1072_v38 = vsel %vm431_vm4, %v1022_v22, 0.0 }
 0x400   :  { %v1073_v5 = vrot.slane %v1072_v38, 4 }
 0x402   :  { %v1074_v57 = vadd.f32 %v1073_v5, %v1072_v38 }
 0x404   :  { %v1075_v21 = vrot.slane %v1074_v57, 2 }
 0x413   :  { %v1008_v0 = vpop.permute.xlu1 %1007 }
 0x414   :  { %v1021_v2 = vmul.f32 %v1008_v0, %v1746_v44  ;;  %v1028_v44 = vrot.slane %v1027_v48, 1 }
 0x416   :  { %v1065_v51 = vsel %vm431_vm4, %v1021_v2, 0.0  ;;  %v1029_v26 = vadd.f32 %v1028_v44, %v1027_v48 }
 0x417   :  { %v1066_v23 = vrot.slane %v1065_v51, 4 }
 0x418   :  { %v1088_v37 = vsel %vm1087_vm7, %v1036_v32, %v1029_v26 }
 0x419   :  { %v1067_v9 = vadd.f32 %v1066_v23, %v1065_v51  ;;  %v1090_v29 = vsel %vm1089_vm8, %v1043_v27, %v1088_v37 }
 0x41a   :  { %v1092_v33 = vsel %vm1091_vm9, %v1050_v36, %v1090_v29 }
 0x41b   :  { %v1002_v62 = vpop.permute.xlu0 %1001  ;;  %v1068_v24 = vrot.slane %v1067_v9, 2  ;;  %v1094_v6 = vsel %vm1093_vm10, %v1057_v41, %v1092_v33 }
 0x41c   :  { %v1020_v12 = vmul.f32 %v1002_v62, %v1740_v34  ;;  %v1076_v34 = vadd.f32 %v1075_v21, %v1074_v57 }
 0x41d   :  { %v1069_v35 = vadd.f32 %v1068_v24, %v1067_v9 }
 0x41e   :  { %v1058_v46 = vsel %vm431_vm4, %v1020_v12, 0.0  ;;  %v1077_v45 = vrot.slane %v1076_v34, 1 }
 0x41f   :  { %v1059_v25 = vrot.slane %v1058_v46, 4  ;;  %v1070_v42 = vrot.slane %v1069_v35, 1 }
 0x420   :  { %v1078_v52 = vadd.f32 %v1077_v45, %v1076_v34 }
 0x421   :  { %v1060_v11 = vadd.f32 %v1059_v25, %v1058_v46  ;;  %v1071_v50 = vadd.f32 %v1070_v42, %v1069_v35 }
 0x423   :  { %v1061_v39 = vrot.slane %v1060_v11, 2 }
 0x425   :  { %v1062_v40 = vadd.f32 %v1061_v39, %v1060_v11 }
 0x427   :  { %v1063_v47 = vrot.slane %v1062_v40, 1 }
 0x429   :  { %v1064_v49 = vadd.f32 %v1063_v47, %v1062_v40 }
 0x42b   :  { %v1096_v53 = vsel %vm1095_vm11, %v1064_v49, %v1094_v6 }
 0x42c   :  { %v1098_v54 = vsel %vm1097_vm12, %v1071_v50, %v1096_v53 }
 0x42d   :  { %v1100_v55 = vsel %vm1099_vm13, %v1078_v52, %v1098_v54 }
 0x42e   :  { %v1102_v56 = vsel %vm431_vm4, %v1100_v55, 0.0 }
 0x42f   :  { %1103 = vst [vmem:[#allocation2] sm:$0xff] %v1102_v56 }
 0x430   :  { %1114 = dma.vmem_to_hbm [thread:$0]  %s1110_s30, 128, %s1112_s14, [#allocation3]  }
 0x431   :  { %1404 = dma.done.wait [#allocation3], 128  }
 0x432   :  { %1405 = vsyncadd [#allocation3], 4294967168 }
 0x433   :  { %1119 = vsyncpa [#allocation3], 1 }

// kernel: tpu_custom_call.1
= control target key start
LH: loop header
LB: loop body
LE: loop exit
PB: predicated region body
PF: predicated region fallthrough
CT: control target
= control target key end

     0   :  { %s1846_s0 = inlined_call_operand.vmem [shape: bf16[128,64], index: 0, kind: input, shape index: {}]   ;;  %s1847_s1 = inlined_call_operand.vmem [shape: bf16[128,32], index: 1, kind: input, shape index: {}]   ;;  %s1848_s2 = inlined_call_operand.vmem [shape: f32[8,8], index: 2, kind: input, shape index: {}]   ;;  %s1849_s3 = inlined_call_operand.vmem [shape: bf16[64,32], index: 3, kind: input, shape index: {}]   ;;  %s1850_s4 = inlined_call_operand.vmem [shape: f32[1,32], index: 4, kind: input, shape index: {}]   ;;  %s1851_s5 = inlined_call_operand.vmem [shape: bf16[128,32], index: 5, kind: input, shape index: {}]   ;;  %s1852_s6 = inlined_call_operand.vmem [shape: f32[1,32], index: 6, kind: input, shape index: {}]   ;;  %s1853_s7 = inlined_call_operand.hbm [shape: f32[8,128], index: 7, kind: output, shape index: {}]  }
   0x1   :  { %v1217_v0 = vld [vmem:[%s1849_s3 + $0x18] sm:$0xff]  ;;  %v1216_v1 = vld [vmem:[%s1849_s3 + $0x10] sm:$0xff] }
   0x2   :  { %149 = vmatpush.bf16.msra.mxu0 %v1217_v0  ;;  %1265 = vmatpush.bf16.msra.mxu2 %v1217_v0 }
   0x3   :  { %12 = vsyncpa [#allocation3], 0  ;;  %v1215_v2 = vld [vmem:[%s1849_s3 + $0x8] sm:$0xff]  ;;  %v1214_v3 = vld [vmem:[%s1849_s3] sm:$0xff]  ;;  %vm120_vm0 = vcmask 523264   ;;  %vm372_vm1 = vcmask 1044480  }
   0x4   :  { %v1206_v4 = vld [vmem:[%s1846_s0] sm:$0xff]  ;;  %v1207_v5 = vld [vmem:[%s1846_s0 + $0x8] sm:$0xff]  ;;  %v1212_v6 = vld [vmem:[%s1846_s0 + $0x30] sm:$0xff]  ;;  %vm274_vm2 = vcmask 1046528   ;;  %s1397_s29 = smov 32   ;;  %vm323_vm3 = vcmask 1045504  }
   0x5   :  { %v1208_v7 = vld [vmem:[%s1846_s0 + $0x10] sm:$0xff]  ;;  %v1213_v8 = vld [vmem:[%s1846_s0 + $0x38] sm:$0xff]  ;;  %v1210_v10 = vld [vmem:[%s1846_s0 + $0x20] sm:$0xff]  ;;  %s1398_s30 = smov 64   ;;  %vm421_vm4 = vcmask 261120   ;;  %vm438_vm5 = vcmask 785408  }
   0x6   :  { %150 = vmatpush.bf16.msra.mxu0 %v1216_v1  ;;  %1266 = vmatpush.bf16.msra.mxu2 %v1216_v1  ;;  %v1209_v9 = vld [vmem:[%s1846_s0 + $0x18] sm:$0xff]  ;;  %v1211_v11 = vld [vmem:[%s1846_s0 + $0x28] sm:$0xff]  ;;  %v1487_v14 = vld [vmem:[%s1850_s4] ss:$0 sm:$0xff]  ;;  %s1396_s4 = smov 96   ;;  %vm748_vm6 = vcmask 64512  }
   0x7   :  { %v1227_v18 = vld [vmem:[%s1847_s1] sm:$0xff]   ;;  %v1258_v20 = vld [vmem:[%s1847_s1 + $0x8] sm:$0xff]   ;;  %v1259_v61 = vld [vmem:[%s1847_s1 + $0x10] sm:$0xff]   ;;  %vm1077_vm7 = vcmask 1041409   ;;  %vm1079_vm8 = vcmask 1042434   ;;  %vm1081_vm9 = vcmask 1043459  }
   0x8   :  { %v1229_v22 = vunpack.c.h.bf16 %v1227_v18  ;;  %v1228_v24 = vunpack.c.l.bf16 %v1227_v18  ;;  %v1232_v26 = vunpack.c.l.bf16 %v1258_v20  ;;  %v1233_v30 = vunpack.c.h.bf16 %v1258_v20  ;;  %v1260_v0 = vld [vmem:[%s1847_s1 + $0x18] sm:$0xff]   ;;  %s1101_s14 = sshll.u32 %s1853_s7, 4  ;;  %s1102_s14 = int_to_ptr.hbm [resolvable:$true] %s1101_s14 }
   0x9   :  { %vm1083_vm10 = vcmask 1044484   ;;  %vm1085_vm11 = vcmask 1045509   ;;  %vm1087_vm12 = vcmask 1046534   ;;  %vm1089_vm13 = vcmask 1047559  }
   0xa   :  { %151 = vmatpush.bf16.msra.mxu0 %v1215_v2  ;;  %1267 = vmatpush.bf16.msra.mxu2 %v1215_v2  ;;  %v1237_v2 = vunpack.c.h.bf16 %v1259_v61 }
   0xe   :  { %152 = vmatpush.bf16.msra.mxu0 %v1214_v3  ;;  %1268 = vmatpush.bf16.msra.mxu2 %v1214_v3 }
  0x11   :  { %1158 = vmatmul.msk.bf16.vlgmr.msra.gmra.mxu0 %vm120_vm0, %v1206_v4  ;;  %1164 = vmatmul.msk.bf16.vlgmr.msra.gmra.mxu2 %vm120_vm0, %v1212_v6  ;;  %v1236_v4 = vunpack.c.l.bf16 %v1259_v61  ;;  %v1240_v6 = vunpack.c.l.bf16 %v1260_v0 }
  0x21   :  { %1159 = vmatmul.msk.bf16.gmra.mxu0 %vm120_vm0, %v1207_v5  ;;  %1165 = vmatmul.msk.bf16.gmra.mxu2 %vm120_vm0, %v1213_v8 }
  0x31   :  { %1160 = vmatmul.msk.bf16.gmra.mxu0 %vm120_vm0, %v1208_v7 }
  0x41   :  { %1161 = vmatmul.msk.bf16.gmra.mxu0 %vm120_vm0, %v1209_v9 }
  0x51   :  { %1162 = vmatmul.msk.bf16.gmra.mxu0 %vm120_vm0, %v1210_v10  ;;  %v1241_v10 = vunpack.c.h.bf16 %v1260_v0 }
  0x61   :  { %1163 = vmatmul.msk.bf16.gmra.mxu0 %vm120_vm0, %v1211_v11 }
  0x8e   :  { %v154_v12 = vpop.f32.mrf.mxu0 }
  0x8f   :  { %v155_v17 = vadd.f32 %v1487_v14, %v154_v12 }
  0x91   :  { %v194_v23 = vmax.f32 %v155_v17, 0.0 }
  0x93   :  { %v1499_v31 = vmul.f32 %v1228_v24, %v194_v23 }
  0x94   :  { %v184_v63 = vpop.f32.mrf.mxu2 }
  0x95   :  { %v373_v37 = vrot.slane %v1499_v31, 3  ;;  %v275_v38 = vrot.slane %v1499_v31, 1  ;;  %v324_v53 = vrot.slane %v1499_v31, 2 }
  0x96   :  { %v156_v13 = vpop.f32.mrf.mxu0 }
  0x97   :  { %v157_v16 = vadd.f32 %v1487_v14, %v156_v13 }
  0x99   :  { %v195_v21 = vmax.f32 %v157_v16, 0.0 }
  0x9b   :  { %v243_v28 = vmul.f32 %v1229_v22, %v195_v21 }
  0x9c   :  { %v186_v17 = vpop.f32.mrf.mxu2 }
  0x9d   :  { %v374_v35 = vrot.slane %v243_v28, 3  ;;  %v276_v36 = vrot.slane %v243_v28, 1  ;;  %v325_v51 = vrot.slane %v243_v28, 2 }
  0x9e   :  { %v159_v15 = vpop.f32.mrf.mxu0 }
  0x9f   :  { %v160_v19 = vadd.f32 %v1487_v14, %v159_v15  ;;  %v375_v44 = vsel %vm372_vm1, %v373_v37, %v374_v35  ;;  %v277_v46 = vsel %vm274_vm2, %v275_v38, %v276_v36  ;;  %v326_v56 = vsel %vm323_vm3, %v324_v53, %v325_v51  ;;  %v1261_v51 = vld [vmem:[%s1847_s1 + $0x20] sm:$0xff]  }
  0xa0   :  { %v185_v53 = vadd.f32 %v1487_v14, %v184_v63  ;;  %v1264_v63 = vld [vmem:[%s1847_s1 + $0x38] sm:$0xff]  }
  0xa1   :  { %v196_v25 = vmax.f32 %v160_v19, 0.0 }
  0xa3   :  { %v1501_v32 = vmul.f32 %v1232_v26, %v196_v25 }
  0xa4   :  { %v189_v37 = vpop.f32.mrf.mxu2 }
  0xa5   :  { %v376_v39 = vrot.slane %v1501_v32, 3  ;;  %v278_v41 = vrot.slane %v1501_v32, 1  ;;  %v327_v52 = vrot.slane %v1501_v32, 2  ;;  %v190_v0 = vadd.f32 %v1487_v14, %v189_v37 }
  0xa6   :  { %v161_v27 = vpop.f32.mrf.mxu0 }
  0xa7   :  { %v162_v29 = vadd.f32 %v1487_v14, %v161_v27 }
  0xa9   :  { %v197_v33 = vmax.f32 %v162_v29, 0.0 }
  0xab   :  { %v245_v34 = vmul.f32 %v1233_v30, %v197_v33 }
  0xad   :  { %v377_v40 = vrot.slane %v245_v34, 3  ;;  %v279_v42 = vrot.slane %v245_v34, 1  ;;  %v328_v50 = vrot.slane %v245_v34, 2 }
  0xae   :  { %v164_v43 = vpop.f32.mrf.mxu0 }
  0xaf   :  { %v378_v45 = vsel %vm372_vm1, %v376_v39, %v377_v40  ;;  %v280_v47 = vsel %vm274_vm2, %v278_v41, %v279_v42  ;;  %v329_v54 = vsel %vm323_vm3, %v327_v52, %v328_v50  ;;  %v165_v60 = vadd.f32 %v1487_v14, %v164_v43  ;;  %v1225_v43 = vld [vmem:[%s1851_s5 + $0x38] sm:$0xff]  ;;  %v191_v50 = vpop.f32.mrf.mxu2 }
  0xb0   :  { %v1283_v48 = vpack.i.bf16 %v378_v45, %v375_v44  ;;  %v1273_v49 = vpack.i.bf16 %v280_v47, %v277_v46  ;;  %v1278_v57 = vpack.i.bf16 %v329_v54, %v326_v56  ;;  %v187_v44 = vadd.f32 %v1487_v14, %v186_v17  ;;  %519 = vmatpush.bf16.msra.mxu1 %v1225_v43  ;;  %v1224_v45 = vld [vmem:[%s1851_s5 + $0x30] sm:$0xff]  ;;  %v1262_v56 = vld [vmem:[%s1847_s1 + $0x28] sm:$0xff]  }
  0xb1   :  { %v198_v3 = vmax.f32 %v165_v60, 0.0  ;;  %v1263_v46 = vld [vmem:[%s1847_s1 + $0x30] sm:$0xff]   ;;  %v192_v60 = vadd.f32 %v1487_v14, %v191_v50 }
  0xb2   :  { %1284 = vrot.lane.b32.xlu1 %v1283_v48, %s1396_s4  ;;  %1274 = vrot.lane.b32.xlu0 %v1273_v49, %s1397_s29  ;;  %v207_v54 = vmax.f32 %v187_v44, 0.0 }
  0xb3   :  { %v1528_v11 = vmul.f32 %v1236_v4, %v198_v3  ;;  %v206_v3 = vmax.f32 %v185_v53, 0.0  ;;  %v1252_v4 = vunpack.c.l.bf16 %v1263_v46 }
  0xb4   :  { %520 = vmatpush.bf16.msra.mxu1 %v1224_v45 }
  0xb5   :  { %v330_v19 = vrot.slane %v1528_v11, 2  ;;  %v281_v20 = vrot.slane %v1528_v11, 1  ;;  %v379_v38 = vrot.slane %v1528_v11, 3 }
  0xb6   :  { %v166_v55 = vpop.f32.mrf.mxu0 }
  0xb7   :  { %v167_v59 = vadd.f32 %v1487_v14, %v166_v55  ;;  %v1253_v55 = vunpack.c.h.bf16 %v1263_v46 }
  0xb9   :  { %v199_v1 = vmax.f32 %v167_v59, 0.0  ;;  %v1245_v59 = vunpack.c.h.bf16 %v1261_v51 }
  0xba   :  { %1279 = vrot.lane.b32.xlu0 %v1278_v57, %s1398_s30  ;;  %v1223_v57 = vld [vmem:[%s1851_s5 + $0x28] sm:$0xff] }
  0xbb   :  { %v247_v8 = vmul.f32 %v1237_v2, %v199_v1  ;;  %v1248_v2 = vunpack.c.l.bf16 %v1262_v56  ;;  %521 = vmatpush.bf16.msra.mxu1 %v1223_v57 }
  0xbd   :  { %v282_v15 = vrot.slane %v247_v8, 1  ;;  %v331_v18 = vrot.slane %v247_v8, 2  ;;  %v380_v35 = vrot.slane %v247_v8, 3  ;;  %v1256_v8 = vunpack.c.l.bf16 %v1264_v63 }
  0xbe   :  { %v169_v58 = vpop.f32.mrf.mxu0 }
  0xbf   :  { %v170_v62 = vadd.f32 %v1487_v14, %v169_v58  ;;  %v332_v26 = vsel %vm323_vm3, %v330_v19, %v331_v18  ;;  %v283_v28 = vsel %vm274_vm2, %v281_v20, %v282_v15  ;;  %v381_v41 = vsel %vm372_vm1, %v379_v38, %v380_v35 }
  0xc0   :  { %v1249_v18 = vunpack.c.h.bf16 %v1262_v56  ;;  %v1585_v20 = vmul.f32 %v1252_v4, %v206_v3 }
  0xc1   :  { %v200_v5 = vmax.f32 %v170_v62, 0.0  ;;  %v1244_v62 = vunpack.c.l.bf16 %v1261_v51 }
  0xc3   :  { %v1530_v12 = vmul.f32 %v1240_v6, %v200_v5  ;;  %v1575_v5 = vmul.f32 %v1253_v55, %v207_v54  ;;  %v1222_v6 = vld [vmem:[%s1851_s5 + $0x20] sm:$0xff]  ;;  %v342_v54 = vrot.slane %v1585_v20, 2 }
  0xc4   :  { %522 = vmatpush.bf16.msra.mxu1 %v1222_v6  ;;  %v1219_v6 = vld [vmem:[%s1851_s5 + $0x8] sm:$0xff] }
  0xc5   :  { %v333_v22 = vrot.slane %v1530_v12, 2  ;;  %v284_v24 = vrot.slane %v1530_v12, 1  ;;  %v382_v36 = vrot.slane %v1530_v12, 3  ;;  %v294_v56 = vrot.slane %v1575_v5, 1 }
  0xc6   :  { %v171_v7 = vpop.f32.mrf.mxu0 }
  0xc7   :  { %v172_v9 = vadd.f32 %v1487_v14, %v171_v7 }
  0xc9   :  { %v201_v13 = vmax.f32 %v172_v9, 0.0  ;;  %v209_v9 = vmax.f32 %v192_v60, 0.0 }
  0xcb   :  { %v249_v16 = vmul.f32 %v1241_v10, %v201_v13  ;;  %v1257_v10 = vunpack.c.h.bf16 %v1264_v63 }
  0xcd   :  { %v285_v21 = vrot.slane %v249_v16, 1  ;;  %v334_v23 = vrot.slane %v249_v16, 2  ;;  %v383_v34 = vrot.slane %v249_v16, 3  ;;  %v208_v16 = vmax.f32 %v190_v0, 0.0 }
  0xce   :  { %v174_v25 = vpop.f32.mrf.mxu0 }
  0xcf   :  { %v335_v27 = vsel %vm323_vm3, %v333_v22, %v334_v23  ;;  %v286_v29 = vsel %vm274_vm2, %v284_v24, %v285_v21  ;;  %v384_v39 = vsel %vm372_vm1, %v382_v36, %v383_v34  ;;  %v175_v49 = vadd.f32 %v1487_v14, %v174_v25  ;;  %v1221_v22 = vld [vmem:[%s1851_s5 + $0x18] sm:$0xff] }
  0xd0   :  { %v1293_v30 = vpack.i.bf16 %v335_v27, %v332_v26  ;;  %v1288_v33 = vpack.i.bf16 %v286_v29, %v283_v28  ;;  %v1298_v42 = vpack.i.bf16 %v384_v39, %v381_v41  ;;  %v343_v23 = vrot.slane %v1575_v5, 2  ;;  %523 = vmatpush.bf16.msra.mxu1 %v1221_v22 }
  0xd1   :  { %v202_v61 = vmax.f32 %v175_v49, 0.0  ;;  %v257_v26 = vmul.f32 %v1257_v10, %v209_v9  ;;  %v1591_v28 = vmul.f32 %v1256_v8, %v208_v16 }
  0xd2   :  { %1294 = vrot.lane.b32.xlu2 %v1293_v30, %s1398_s30  ;;  %1289 = vrot.lane.b32.xlu1 %v1288_v33, %s1397_s29 }
  0xd3   :  { %v1580_v15 = vmul.f32 %v1244_v62, %v202_v61  ;;  %v346_v41 = vrot.slane %v257_v26, 2  ;;  %v394_v53 = vrot.slane %v1591_v28, 3  ;;  %v345_v55 = vrot.slane %v1591_v28, 2 }
  0xd4   :  { %v297_v57 = vrot.slane %v257_v26, 1  ;;  %v344_v62 = vsel %vm323_vm3, %v342_v54, %v343_v23 }
  0xd5   :  { %v385_v29 = vrot.slane %v1580_v15, 3  ;;  %v336_v33 = vrot.slane %v1580_v15, 2  ;;  %v287_v35 = vrot.slane %v1580_v15, 1  ;;  %v347_v0 = vsel %vm323_vm3, %v345_v55, %v346_v41 }
  0xd6   :  { %v176_v40 = vpop.f32.mrf.mxu0  ;;  %v1323_v3 = vpack.i.bf16 %v347_v0, %v344_v62 }
  0xd7   :  { %v177_v47 = vadd.f32 %v1487_v14, %v176_v40  ;;  %v392_v40 = vrot.slane %v1575_v5, 3  ;;  %v1220_v5 = vld [vmem:[%s1851_s5 + $0x10] sm:$0xff] }
  0xd8   :  { %524 = vmatpush.bf16.msra.mxu1 %v1220_v5 }
  0xd9   :  { %v203_v58 = vmax.f32 %v177_v47, 0.0 }
  0xda   :  { %1299 = vrot.lane.b32.xlu2 %v1298_v42, %s1396_s4 }
  0xdb   :  { %v251_v7 = vmul.f32 %v1245_v59, %v203_v58  ;;  %v293_v58 = vrot.slane %v1585_v20, 1  ;;  %v296_v59 = vrot.slane %v1591_v28, 1 }
  0xdc   :  { %525 = vmatpush.bf16.msra.mxu1 %v1219_v6 }
  0xdd   :  { %v337_v24 = vrot.slane %v251_v7, 2  ;;  %v386_v25 = vrot.slane %v251_v7, 3  ;;  %v288_v27 = vrot.slane %v251_v7, 1  ;;  %v295_v63 = vsel %vm274_vm2, %v293_v58, %v294_v56  ;;  %v1218_v7 = vld [vmem:[%s1851_s5] sm:$0xff] }
  0xde   :  { %v179_v48 = vpop.f32.mrf.mxu0 }
  0xdf   :  { %v180_v52 = vadd.f32 %v1487_v14, %v179_v48  ;;  %v387_v42 = vsel %vm372_vm1, %v385_v29, %v386_v25  ;;  %v338_v43 = vsel %vm323_vm3, %v336_v33, %v337_v24  ;;  %v289_v46 = vsel %vm274_vm2, %v287_v35, %v288_v27 }
  0xe0   :  { %v395_v48 = vrot.slane %v257_v26, 3  ;;  %526 = vmatpush.bf16.msra.mxu1 %v1218_v7 }
  0xe1   :  { %v204_v1 = vmax.f32 %v180_v52, 0.0  ;;  %v391_v52 = vrot.slane %v1585_v20, 3 }
  0xe2   :  { %v396_v61 = vsel %vm372_vm1, %v394_v53, %v395_v48 }
  0xe3   :  { %v1583_v19 = vmul.f32 %v1248_v2, %v204_v1  ;;  %v393_v60 = vsel %vm372_vm1, %v391_v52, %v392_v40  ;;  %v298_v1 = vsel %vm274_vm2, %v296_v59, %v297_v57 }
  0xe4   :  { %v1328_v2 = vpack.i.bf16 %v396_v61, %v393_v60  ;;  %v1318_v4 = vpack.i.bf16 %v298_v1, %v295_v63 }
  0xe5   :  { %v388_v30 = vrot.slane %v1583_v19, 3  ;;  %v339_v34 = vrot.slane %v1583_v19, 2  ;;  %v290_v39 = vrot.slane %v1583_v19, 1 }
  0xe6   :  { %v181_v13 = vpop.f32.mrf.mxu0 }
  0xe7   :  { %v182_v17 = vadd.f32 %v1487_v14, %v181_v13 }
  0xe9   :  { %v205_v21 = vmax.f32 %v182_v17, 0.0 }
  0xeb   :  { %v253_v14 = vmul.f32 %v1249_v18, %v205_v21 }
  0xed   :  { %v291_v36 = vrot.slane %v253_v14, 1  ;;  %v340_v37 = vrot.slane %v253_v14, 2  ;;  %v389_v38 = vrot.slane %v253_v14, 3 }
  0xef   :  { %v390_v44 = vsel %vm372_vm1, %v388_v30, %v389_v38  ;;  %v341_v45 = vsel %vm323_vm3, %v339_v34, %v340_v37  ;;  %v292_v47 = vsel %vm274_vm2, %v290_v39, %v291_v36 }
  0xf0   :  { %v1313_v49 = vpack.i.bf16 %v390_v44, %v387_v42  ;;  %v1308_v50 = vpack.i.bf16 %v341_v45, %v338_v43  ;;  %v1303_v51 = vpack.i.bf16 %v292_v47, %v289_v46 }
  0xf2   :  { %1314 = vrot.lane.b32.xlu2 %v1313_v49, %s1396_s4  ;;  %1309 = vrot.lane.b32.xlu1 %v1308_v50, %s1398_s30 }
  0xf3   :  { %1304 = vrot.lane.b32.xlu0 %v1303_v51, %s1397_s29 }
  0xfa   :  { %1329 = vrot.lane.b32.xlu2 %v1328_v2, %s1396_s4  ;;  %1324 = vrot.lane.b32.xlu1 %v1323_v3, %s1398_s30 }
  0xfb   :  { %1319 = vrot.lane.b32.xlu0 %v1318_v4, %s1397_s29 }
 0x124   :  { %v1275_v8 = vpop.permute.xlu0 %1274  ;;  %v1285_v13 = vpop.permute.xlu1 %1284 }
 0x125   :  { %v1277_v9 = vunpack.i.h.bf16 %v1275_v8  ;;  %v1276_v10 = vunpack.i.l.bf16 %v1275_v8  ;;  %v1287_v21 = vunpack.i.h.bf16 %v1285_v13  ;;  %v1286_v22 = vunpack.i.l.bf16 %v1285_v13 }
 0x127   :  { %v423_v23 = vsel %vm421_vm4, %v1501_v32, %v1277_v9  ;;  %v422_v24 = vsel %vm421_vm4, %v1499_v31, %v1276_v10 }
 0x12c   :  { %v1280_v16 = vpop.permute.xlu0 %1279  ;;  %v1295_v30 = vpop.permute.xlu2 %1294 }
 0x12d   :  { %v1282_v17 = vunpack.i.h.bf16 %v1280_v16  ;;  %v1281_v18 = vunpack.i.l.bf16 %v1280_v16  ;;  %v1297_v37 = vunpack.i.h.bf16 %v1295_v30  ;;  %v1296_v32 = vunpack.i.l.bf16 %v1295_v30 }
 0x12f   :  { %v430_v25 = vsel %vm120_vm0, %v422_v24, %v1281_v18  ;;  %v431_v26 = vsel %vm120_vm0, %v423_v23, %v1282_v17 }
 0x130   :  { %v439_v27 = vsel %vm438_vm5, %v430_v25, %v1286_v22  ;;  %v440_v14 = vsel %vm438_vm5, %v431_v26, %v1287_v21 }
 0x131   :  { %v447_v29 = vpack.c.bf16 %v440_v14, %v439_v27 }
 0x133   :  { %527 = vmatmul.bf16.vlgmr.msra.gmra.mxu1 %v447_v29 }
 0x134   :  { %v1300_v33 = vpop.permute.xlu2 %1299 }
 0x135   :  { %v1302_v38 = vunpack.i.h.bf16 %v1300_v33  ;;  %v1301_v39 = vunpack.i.l.bf16 %v1300_v33 }
 0x144   :  { %v1290_v34 = vpop.permute.xlu1 %1289 }
 0x145   :  { %v1292_v35 = vunpack.i.h.bf16 %v1290_v34  ;;  %v1291_v36 = vunpack.i.l.bf16 %v1290_v34 }
 0x147   :  { %v425_v31 = vsel %vm421_vm4, %v1530_v12, %v1292_v35  ;;  %v424_v40 = vsel %vm421_vm4, %v1528_v11, %v1291_v36 }
 0x148   :  { %v432_v41 = vsel %vm120_vm0, %v424_v40, %v1296_v32  ;;  %v433_v42 = vsel %vm120_vm0, %v425_v31, %v1297_v37 }
 0x149   :  { %v441_v43 = vsel %vm438_vm5, %v432_v41, %v1301_v39  ;;  %v442_v44 = vsel %vm438_vm5, %v433_v42, %v1302_v38 }
 0x14a   :  { %v448_v45 = vpack.c.bf16 %v442_v44, %v441_v43 }
 0x14c   :  { %532 = vmatmul.bf16.gmra.mxu1 %v448_v45  ;;  %v1315_v47 = vpop.permute.xlu2 %1314 }
 0x14d   :  { %v1317_v52 = vunpack.i.h.bf16 %v1315_v47  ;;  %v1316_v53 = vunpack.i.l.bf16 %v1315_v47  ;;  %v1720_v47 = vld [vmem:[%s1848_s2] sm:$0xff]  ;;  %s1399_s2 = smov [#allocation2]  }
 0x14e   :  { %s1099_s30 = sshll.u32 %s1399_s2, 4  ;;  %s1100_s30 = int_to_ptr.vmem [resolvable:$true] %s1099_s30 }
 0x154   :  { %v1330_v2 = vpop.permute.xlu2 %1329 }
 0x155   :  { %v1332_v5 = vunpack.i.h.bf16 %v1330_v2  ;;  %v1331_v6 = vunpack.i.l.bf16 %v1330_v2 }
 0x164   :  { %v1310_v46 = vpop.permute.xlu1 %1309 }
 0x165   :  { %v1312_v48 = vunpack.i.h.bf16 %v1310_v46  ;;  %v1311_v49 = vunpack.i.l.bf16 %v1310_v46  ;;  %v1305_v50 = vpop.permute.xlu0 %1304 }
 0x166   :  { %v1307_v51 = vunpack.i.h.bf16 %v1305_v50  ;;  %v1306_v12 = vunpack.i.l.bf16 %v1305_v50  ;;  %v686_v50 = vrot.slane %v1720_v47, 1 }
 0x168   :  { %v427_v11 = vsel %vm421_vm4, %v1583_v19, %v1307_v51  ;;  %v426_v54 = vsel %vm421_vm4, %v1580_v15, %v1306_v12  ;;  %v701_v12 = vsub.f32 1.0, %v686_v50 }
 0x169   :  { %v434_v55 = vsel %vm120_vm0, %v426_v54, %v1311_v49  ;;  %v435_v56 = vsel %vm120_vm0, %v427_v11, %v1312_v48  ;;  %v700_v48 = vsub.f32 1.0, %v1720_v47 }
 0x16a   :  { %v443_v57 = vsel %vm438_vm5, %v434_v55, %v1316_v53  ;;  %v444_v58 = vsel %vm438_vm5, %v435_v56, %v1317_v52  ;;  %v709_v11 = vmul.f32 1e+09, %v701_v12 }
 0x16b   :  { %v449_v59 = vpack.c.bf16 %v444_v58, %v443_v57  ;;  %v708_v49 = vmul.f32 1e+09, %v700_v48 }
 0x16c   :  { %v1325_v61 = vpop.permute.xlu1 %1324  ;;  %v725_v55 = vperm.slane %v709_v11, 0 }
 0x16d   :  { %v1320_v60 = vpop.permute.xlu0 %1319  ;;  %537 = vmatmul.bf16.gmra.mxu1 %v449_v59  ;;  %v1327_v63 = vunpack.i.h.bf16 %v1325_v61  ;;  %v1326_v1 = vunpack.i.l.bf16 %v1325_v61  ;;  %v724_v51 = vperm.slane %v708_v49, 0  ;;  %v687_v59 = vrot.slane %v1720_v47, 2 }
 0x16e   :  { %v1322_v62 = vunpack.i.h.bf16 %v1320_v60  ;;  %v1321_v0 = vunpack.i.l.bf16 %v1320_v60 }
 0x16f   :  { %v702_v61 = vsub.f32 1.0, %v687_v59  ;;  %v851_v59 = vperm.slane %v1720_v47, 2 }
 0x170   :  { %v429_v19 = vsel %vm421_vm4, %v1591_v28, %v1322_v62  ;;  %v428_v15 = vsel %vm421_vm4, %v1585_v20, %v1321_v0  ;;  %v1337_v28 = vld [vmem:[%s1852_s6] ss:$0 sm:$0xff] }
 0x171   :  { %v436_v3 = vsel %vm120_vm0, %v428_v15, %v1326_v1  ;;  %v437_v4 = vsel %vm120_vm0, %v429_v19, %v1327_v63  ;;  %v710_v0 = vmul.f32 1e+09, %v702_v61  ;;  %v688_v63 = vrot.slane %v1720_v47, 3 }
 0x172   :  { %v445_v7 = vsel %vm438_vm5, %v436_v3, %v1331_v6  ;;  %v446_v8 = vsel %vm438_vm5, %v437_v4, %v1332_v5  ;;  %v837_v61 = vperm.slane %v1720_v47, 0 }
 0x173   :  { %v450_v9 = vpack.c.bf16 %v446_v8, %v445_v7  ;;  %v726_v1 = vperm.slane %v710_v0, 0  ;;  %v703_v19 = vsub.f32 1.0, %v688_v63 }
 0x175   :  { %v711_v3 = vmul.f32 1e+09, %v703_v19 }
 0x177   :  { %v727_v5 = vperm.slane %v711_v3, 0 }
 0x17d   :  { %542 = vmatmul.bf16.gmra.mxu1 %v450_v9 }
 0x1b0   :  { %v528_v10 = vpop.f32.mrf.mxu1 }
 0x1b1   :  { %v1669_v13 = vadd.f32 %v1337_v28, %v528_v10  ;;  %v689_v10 = vrot.slane %v1720_v47, 4 }
 0x1b3   :  { %v549_v20 = vpack.c.bf16 %v1669_v13, %v1669_v13 }
 0x1b5   :  { %v558_v16 = vsel %vm421_vm4, %v549_v20, 0 }
 0x1b6   :  { %567 = vmatpush.bf16.xpose.msrb.mxu2 %v558_v16 }
 0x1b8   :  { %v530_v17 = vpop.f32.mrf.mxu1 }
 0x1b9   :  { %v1674_v18 = vadd.f32 %v1337_v28, %v530_v17  ;;  %v690_v17 = vrot.slane %v1720_v47, 5 }
 0x1bb   :  { %v550_v21 = vpack.c.bf16 %v1674_v18, %v1674_v18 }
 0x1bd   :  { %1198 = vmatmul.msk.bf16.vlgmr.msrb.gmra.mxu2 %vm421_vm4, %v549_v20  ;;  %v574_v22 = vsel %vm421_vm4, %v550_v21, 0  ;;  %v704_v20 = vsub.f32 1.0, %v689_v10 }
 0x1be   :  { %583 = vmatpush.bf16.xpose.msra.mxu3 %v574_v22 }
 0x1bf   :  { %v712_v16 = vmul.f32 1e+09, %v704_v20 }
 0x1c5   :  { %1199 = vmatmul.msk.bf16.vlgmr.msra.gmra.mxu3 %vm421_vm4, %v550_v21  ;;  %v838_v21 = vlaneseq }
 0x1c7   :  { %v839_v22 = vshrl.u32 %v838_v21, 7 }
 0x1c9   :  { %v533_v23 = vpop.f32.mrf.mxu1  ;;  %1334 = vset.pattern.permute.xlu1 %v839_v22  ;;  %1335 = vset.pattern.permute.xlu2 %v839_v22 }
 0x1ca   :  { %v1681_v24 = vadd.f32 %v1337_v28, %v533_v23  ;;  %v728_v23 = vperm.slane %v712_v16, 0  ;;  %1333 = vset.pattern.permute.xlu0 %v839_v22 }
 0x1cc   :  { %v551_v25 = vpack.c.bf16 %v1681_v24, %v1681_v24 }
 0x1ce   :  { %v590_v26 = vsel %vm421_vm4, %v551_v25, 0 }
 0x1cf   :  { %599 = vmatpush.bf16.xpose.msra.mxu2 %v590_v26 }
 0x1d1   :  { %v535_v27 = vpop.f32.mrf.mxu1 }
 0x1d2   :  { %v1686_v14 = vadd.f32 %v1337_v28, %v535_v27 }
 0x1d4   :  { %v552_v29 = vpack.c.bf16 %v1686_v14, %v1686_v14 }
 0x1d6   :  { %1200 = vmatmul.msk.bf16.vlgmr.msra.gmra.mxu2 %vm421_vm4, %v551_v25  ;;  %v606_v30 = vsel %vm421_vm4, %v552_v29, 0  ;;  %v705_v25 = vsub.f32 1.0, %v690_v17 }
 0x1d7   :  { %615 = vmatpush.bf16.xpose.msrb.mxu3 %v606_v30  ;;  %v691_v30 = vrot.slane %v1720_v47, 6 }
 0x1de   :  { %1201 = vmatmul.msk.bf16.vlgmr.msrb.gmra.mxu3 %vm421_vm4, %v552_v29  ;;  %v713_v29 = vmul.f32 1e+09, %v705_v25 }
 0x1ea   :  { %v538_v33 = vpop.f32.mrf.mxu1 }
 0x1eb   :  { %v1693_v34 = vadd.f32 %v1337_v28, %v538_v33 }
 0x1ed   :  { %v553_v35 = vpack.c.bf16 %v1693_v34, %v1693_v34 }
 0x1ef   :  { %v622_v36 = vsel %vm421_vm4, %v553_v35, 0 }
 0x1f0   :  { %631 = vmatpush.bf16.xpose.msrb.mxu2 %v622_v36  ;;  %v706_v36 = vsub.f32 1.0, %v691_v30 }
 0x1f2   :  { %v540_v37 = vpop.f32.mrf.mxu1 }
 0x1f3   :  { %v1698_v32 = vadd.f32 %v1337_v28, %v540_v37 }
 0x1f5   :  { %v554_v38 = vpack.c.bf16 %v1698_v32, %v1698_v32 }
 0x1f7   :  { %1202 = vmatmul.msk.bf16.vlgmr.msrb.gmra.mxu2 %vm421_vm4, %v553_v35  ;;  %v638_v39 = vsel %vm421_vm4, %v554_v38, 0  ;;  %v729_v35 = vperm.slane %v713_v29, 0 }
 0x1f8   :  { %647 = vmatpush.bf16.xpose.msra.mxu3 %v638_v39 }
 0x1fa   :  { %v543_v31 = vpop.f32.mrf.mxu1 }
 0x1fb   :  { %v1704_v40 = vadd.f32 %v1337_v28, %v543_v31  ;;  %v714_v31 = vmul.f32 1e+09, %v706_v36 }
 0x1fd   :  { %v555_v41 = vpack.c.bf16 %v1704_v40, %v1704_v40 }
 0x1ff   :  { %1203 = vmatmul.msk.bf16.vlgmr.msra.gmra.mxu3 %vm421_vm4, %v554_v38  ;;  %v654_v42 = vsel %vm421_vm4, %v555_v41, 0 }
 0x200   :  { %663 = vmatpush.bf16.xpose.msra.mxu2 %v654_v42 }
 0x202   :  { %v545_v43 = vpop.f32.mrf.mxu1 }
 0x203   :  { %v1710_v44 = vadd.f32 %v1337_v28, %v545_v43  ;;  %v730_v43 = vperm.slane %v714_v31, 0 }
 0x205   :  { %v556_v45 = vpack.c.bf16 %v1710_v44, %v1710_v44 }
 0x207   :  { %1204 = vmatmul.msk.bf16.vlgmr.msra.gmra.mxu2 %vm421_vm4, %v555_v41  ;;  %v670_v46 = vsel %vm421_vm4, %v556_v45, 0  ;;  %v692_v41 = vrot.slane %v1720_v47, 7 }
 0x208   :  { %679 = vmatpush.bf16.xpose.msrb.mxu3 %v670_v46 }
 0x20f   :  { %1205 = vmatmul.msk.bf16.vlgmr.msrb.gmra.mxu3 %vm421_vm4, %v556_v45  ;;  %v707_v45 = vsub.f32 1.0, %v692_v41 }
 0x211   :  { %v715_v50 = vmul.f32 1e+09, %v707_v45 }
 0x213   :  { %v731_v12 = vperm.slane %v715_v50, 0  ;;  %v879_v50 = vperm.slane %v1720_v47, 6 }
 0x240   :  { %v569_v52 = vpop.f32.mrf.mxu2 }
 0x241   :  { %v1724_v53 = vsub.f32 %v569_v52, %v724_v51 }
 0x243   :  { %v749_v54 = vsel %vm748_vm6, %v1724_v53, -inf }
 0x244   :  { %750 = vmax.xlane.f32.xlu0 %v749_v54 }
 0x248   :  { %v571_v56 = vpop.f32.mrf.mxu2  ;;  %v585_v57 = vpop.f32.mrf.mxu3 }
 0x249   :  { %v1728_v58 = vsub.f32 %v585_v57, %v725_v55  ;;  %v844_v57 = vperm.slane %v1720_v47, 1 }
 0x24b   :  { %v752_v60 = vsel %vm748_vm6, %v1728_v58, -inf }
 0x24c   :  { %753 = vmax.xlane.f32.xlu1 %v752_v60  ;;  %v858_v60 = vperm.slane %v1720_v47, 3 }
 0x250   :  { %v587_v62 = vpop.f32.mrf.mxu3 }
 0x251   :  { %v865_v62 = vperm.slane %v1720_v47, 4 }
 0x259   :  { %v601_v15 = vpop.f32.mrf.mxu2 }
 0x25a   :  { %v1734_v2 = vsub.f32 %v601_v15, %v726_v1 }
 0x25c   :  { %v755_v4 = vsel %vm748_vm6, %v1734_v2, -inf }
 0x25d   :  { %756 = vmax.xlane.f32.xlu2 %v755_v4 }
 0x261   :  { %v603_v6 = vpop.f32.mrf.mxu2  ;;  %v617_v7 = vpop.f32.mrf.mxu3 }
 0x262   :  { %v1738_v8 = vsub.f32 %v617_v7, %v727_v5 }
 0x264   :  { %v758_v9 = vsel %vm748_vm6, %v1738_v8, -inf }
 0x265   :  { %759 = vmax.xlane.f32.xlu2 %v758_v9 }
 0x269   :  { %v619_v28 = vpop.f32.mrf.mxu3 }
 0x27a   :  { %v633_v26 = vpop.f32.mrf.mxu2 }
 0x27b   :  { %v1744_v27 = vsub.f32 %v633_v26, %v728_v23 }
 0x27d   :  { %v761_v33 = vsel %vm748_vm6, %v1744_v27, -inf }
 0x27e   :  { %762 = vmax.xlane.f32.xlu0 %v761_v33 }
 0x282   :  { %v635_v37 = vpop.f32.mrf.mxu2  ;;  %v649_v38 = vpop.f32.mrf.mxu3 }
 0x283   :  { %v1749_v39 = vsub.f32 %v649_v38, %v729_v35 }
 0x285   :  { %v764_v42 = vsel %vm748_vm6, %v1749_v39, -inf }
 0x286   :  { %765 = vmax.xlane.f32.xlu1 %v764_v42 }
 0x28a   :  { %v651_v46 = vpop.f32.mrf.mxu3  ;;  %v665_v48 = vpop.f32.mrf.mxu2 }
 0x28b   :  { %v1754_v49 = vsub.f32 %v665_v48, %v730_v43  ;;  %v886_v48 = vperm.slane %v1720_v47, 7 }
 0x28d   :  { %v767_v51 = vsel %vm748_vm6, %v1754_v49, -inf }
 0x28e   :  { %768 = vmax.xlane.f32.xlu2 %v767_v51 }
 0x292   :  { %v667_v52 = vpop.f32.mrf.mxu2  ;;  %v681_v11 = vpop.f32.mrf.mxu3 }
 0x293   :  { %v1758_v54 = vsub.f32 %v681_v11, %v731_v12 }
 0x295   :  { %v770_v55 = vsel %vm748_vm6, %v1758_v54, -inf }
 0x296   :  { %771 = vmax.xlane.f32.xlu0 %v770_v55 }
 0x29a   :  { %v683_v56 = vpop.f32.mrf.mxu3 }
 0x29f   :  { %849 = vperm.xlu1 %1334, %v844_v57  }
 0x2a6   :  { %856 = vperm.xlu2 %1335, %v851_v59  }
 0x2a7   :  { %863 = vperm.xlu1 %1334, %v858_v60  }
 0x2aa   :  { %842 = vperm.xlu0 %1333, %v837_v61  }
 0x2ae   :  { %870 = vperm.xlu2 %1335, %v865_v62  }
 0x2b7   :  { %v751_v0 = vpop.xlane.xlu0 %750 }
 0x2b8   :  { %v773_v63 = vsub.f32 %v1724_v53, %v751_v0 }
 0x2ba   :  { %v781_v19 = vmul.f32 1.442695, %v773_v63 }
 0x2bc   :  { %1338 = vpow2.f32 %v781_v19 }
 0x2bf   :  { %v754_v1 = vpop.xlane.xlu1 %753 }
 0x2c0   :  { %v774_v15 = vsub.f32 %v1728_v58, %v754_v1 }
 0x2c2   :  { %v783_v3 = vmul.f32 1.442695, %v774_v15  ;;  %v1769_v4 = vpop.eup %1338 }
 0x2c3   :  { %v797_v5 = vsel %vm748_vm6, %v1769_v4, 0.0 }
 0x2c4   :  { %1340 = vpow2.f32 %v783_v3 }
 0x2ca   :  { %v1774_v9 = vpop.eup %1340 }
 0x2cb   :  { %v800_v53 = vsel %vm748_vm6, %v1774_v9, 0.0 }
 0x2d0   :  { %v757_v6 = vpop.xlane.xlu2 %756 }
 0x2d1   :  { %798 = vadd.xlane.f32.xlu1 %v797_v5  ;;  %v775_v7 = vsub.f32 %v1734_v2, %v757_v6 }
 0x2d3   :  { %v785_v28 = vmul.f32 1.442695, %v775_v7 }
 0x2d5   :  { %1342 = vpow2.f32 %v785_v28 }
 0x2d7   :  { %801 = vadd.xlane.f32.xlu2 %v800_v53 }
 0x2d8   :  { %v760_v58 = vpop.xlane.xlu2 %759 }
 0x2d9   :  { %v776_v10 = vsub.f32 %v1738_v8, %v760_v58 }
 0x2db   :  { %v1779_v20 = vpop.eup %1342  ;;  %v787_v16 = vmul.f32 1.442695, %v776_v10 }
 0x2dc   :  { %v803_v17 = vsel %vm748_vm6, %v1779_v20, 0.0 }
 0x2dd   :  { %1344 = vpow2.f32 %v787_v16  ;;  %804 = vadd.xlane.f32.xlu0 %v803_v17 }
 0x2e3   :  { %v1783_v2 = vpop.eup %1344 }
 0x2e4   :  { %v806_v21 = vsel %vm748_vm6, %v1783_v2, 0.0 }
 0x2e5   :  { %807 = vadd.xlane.f32.xlu1 %v806_v21 }
 0x2f1   :  { %v763_v22 = vpop.xlane.xlu0 %762 }
 0x2f2   :  { %v777_v23 = vsub.f32 %v1744_v27, %v763_v22 }
 0x2f4   :  { %v789_v25 = vmul.f32 1.442695, %v777_v23 }
 0x2f6   :  { %1346 = vpow2.f32 %v789_v25 }
 0x2f9   :  { %v766_v8 = vpop.xlane.xlu1 %765 }
 0x2fa   :  { %v778_v26 = vsub.f32 %v1749_v39, %v766_v8 }
 0x2fc   :  { %v1789_v29 = vpop.eup %1346  ;;  %v791_v30 = vmul.f32 1.442695, %v778_v26 }
 0x2fd   :  { %v809_v33 = vsel %vm748_vm6, %v1789_v29, 0.0 }
 0x2fe   :  { %1348 = vpow2.f32 %v791_v30  ;;  %810 = vadd.xlane.f32.xlu2 %v809_v33 }
 0x301   :  { %v769_v35 = vpop.xlane.xlu2 %768 }
 0x302   :  { %v779_v36 = vsub.f32 %v1754_v49, %v769_v35  ;;  %v872_v49 = vperm.slane %v1720_v47, 5 }
 0x304   :  { %v1794_v37 = vpop.eup %1348  ;;  %v793_v38 = vmul.f32 1.442695, %v779_v36 }
 0x305   :  { %v812_v27 = vsel %vm748_vm6, %v1794_v37, 0.0 }
 0x306   :  { %1350 = vpow2.f32 %v793_v38  ;;  %813 = vadd.xlane.f32.xlu0 %v812_v27 }
 0x309   :  { %v772_v39 = vpop.xlane.xlu0 %771  ;;  %v857_v12 = vpop.permute.xlu2 %856 }
 0x30a   :  { %v780_v31 = vsub.f32 %v1758_v54, %v772_v39 }
 0x30c   :  { %v1799_v41 = vpop.eup %1350  ;;  %v795_v42 = vmul.f32 1.442695, %v780_v31 }
 0x30d   :  { %v815_v43 = vsel %vm748_vm6, %v1799_v41, 0.0 }
 0x30e   :  { %1352 = vpow2.f32 %v795_v42  ;;  %816 = vadd.xlane.f32.xlu1 %v815_v43 }
 0x311   :  { %v850_v51 = vpop.permute.xlu1 %849  ;;  %v871_v11 = vpop.permute.xlu2 %870 }
 0x314   :  { %v1803_v45 = vpop.eup %1352 }
 0x315   :  { %v818_v46 = vsel %vm748_vm6, %v1803_v45, 0.0 }
 0x316   :  { %819 = vadd.xlane.f32.xlu2 %v818_v46 }
 0x319   :  { %v864_v52 = vpop.permute.xlu1 %863 }
 0x31a   :  { %891 = vperm.xlu0 %1333, %v886_v48  }
 0x31c   :  { %v843_v55 = vpop.permute.xlu0 %842 }
 0x327   :  { %877 = vperm.xlu1 %1334, %v872_v49  }
 0x32e   :  { %884 = vperm.xlu2 %1335, %v879_v50  }
 0x344   :  { %v799_v54 = vpop.xlane.xlu1 %798 }
 0x345   :  { %1354 = vrcp.f32 %v799_v54 }
 0x34a   :  { %v802_v56 = vpop.xlane.xlu2 %801 }
 0x34b   :  { %v1355_v57 = vpop.eup %1354  ;;  %1356 = vrcp.f32 %v802_v56 }
 0x34c   :  { %v829_v59 = vmul.f32 %v1355_v57, %v1769_v4 }
 0x34e   :  { %v893_v60 = vmul.f32 %v843_v55, %v829_v59 }
 0x350   :  { %v901_v61 = vsel %vm748_vm6, %v893_v60, 0.0  ;;  %v805_v62 = vpop.xlane.xlu0 %804 }
 0x351   :  { %v1357_v0 = vpop.eup %1356  ;;  %v902_v63 = vrot.slane %v901_v61, 4  ;;  %1358 = vrcp.f32 %v805_v62 }
 0x352   :  { %v830_v47 = vmul.f32 %v1357_v0, %v1774_v9 }
 0x353   :  { %v903_v1 = vadd.f32 %v902_v63, %v901_v61 }
 0x354   :  { %v894_v19 = vmul.f32 %v850_v51, %v830_v47 }
 0x355   :  { %v904_v15 = vrot.slane %v903_v1, 2 }
 0x356   :  { %v908_v3 = vsel %vm748_vm6, %v894_v19, 0.0 }
 0x357   :  { %v1359_v5 = vpop.eup %1358  ;;  %v905_v6 = vadd.f32 %v904_v15, %v903_v1  ;;  %v909_v7 = vrot.slane %v908_v3, 4 }
 0x358   :  { %v831_v28 = vmul.f32 %v1359_v5, %v1779_v20  ;;  %v808_v4 = vpop.xlane.xlu1 %807 }
 0x359   :  { %1360 = vrcp.f32 %v808_v4  ;;  %v906_v53 = vrot.slane %v905_v6, 1  ;;  %v910_v58 = vadd.f32 %v909_v7, %v908_v3 }
 0x35a   :  { %v895_v10 = vmul.f32 %v857_v12, %v831_v28 }
 0x35b   :  { %v907_v16 = vadd.f32 %v906_v53, %v905_v6  ;;  %v911_v17 = vrot.slane %v910_v58, 2 }
 0x35c   :  { %v915_v21 = vsel %vm748_vm6, %v895_v10, 0.0 }
 0x35d   :  { %961 = vperm.xlu1 %1334, %v907_v16   ;;  %v912_v9 = vadd.f32 %v911_v17, %v910_v58  ;;  %v916_v22 = vrot.slane %v915_v21, 4 }
 0x35f   :  { %v1361_v23 = vpop.eup %1360  ;;  %v913_v25 = vrot.slane %v912_v9, 1  ;;  %v917_v8 = vadd.f32 %v916_v22, %v915_v21 }
 0x360   :  { %v832_v26 = vmul.f32 %v1361_v23, %v1783_v2 }
 0x361   :  { %v914_v30 = vadd.f32 %v913_v25, %v912_v9  ;;  %v918_v33 = vrot.slane %v917_v8, 2 }
 0x362   :  { %v896_v20 = vmul.f32 %v864_v52, %v832_v26 }
 0x363   :  { %967 = vperm.xlu2 %1335, %v914_v30   ;;  %v919_v35 = vadd.f32 %v918_v33, %v917_v8 }
 0x364   :  { %v922_v36 = vsel %vm748_vm6, %v896_v20, 0.0 }
 0x365   :  { %v920_v38 = vrot.slane %v919_v35, 1  ;;  %v923_v27 = vrot.slane %v922_v36, 4 }
 0x367   :  { %v921_v39 = vadd.f32 %v920_v38, %v919_v35  ;;  %v924_v31 = vadd.f32 %v923_v27, %v922_v36 }
 0x369   :  { %973 = vperm.xlu0 %1333, %v921_v39   ;;  %v925_v42 = vrot.slane %v924_v31, 2 }
 0x36b   :  { %v926_v43 = vadd.f32 %v925_v42, %v924_v31 }
 0x36d   :  { %v927_v46 = vrot.slane %v926_v43, 1 }
 0x36f   :  { %v928_v48 = vadd.f32 %v927_v46, %v926_v43 }
 0x371   :  { %v811_v49 = vpop.xlane.xlu2 %810  ;;  %979 = vperm.xlu1 %1334, %v928_v48  }
 0x372   :  { %1362 = vrcp.f32 %v811_v49 }
 0x378   :  { %v1363_v2 = vpop.eup %1362 }
 0x379   :  { %v833_v50 = vmul.f32 %v1363_v2, %v1789_v29  ;;  %v814_v62 = vpop.xlane.xlu0 %813 }
 0x37b   :  { %v897_v51 = vmul.f32 %v871_v11, %v833_v50 }
 0x37d   :  { %v929_v12 = vsel %vm748_vm6, %v897_v51, 0.0 }
 0x37e   :  { %v930_v52 = vrot.slane %v929_v12, 4 }
 0x380   :  { %v931_v54 = vadd.f32 %v930_v52, %v929_v12 }
 0x381   :  { %v817_v56 = vpop.xlane.xlu1 %816 }
 0x382   :  { %v932_v55 = vrot.slane %v931_v54, 2  ;;  %1364 = vrcp.f32 %v817_v56 }
 0x384   :  { %v933_v57 = vadd.f32 %v932_v55, %v931_v54 }
 0x386   :  { %v934_v59 = vrot.slane %v933_v57, 1 }
 0x388   :  { %v935_v60 = vadd.f32 %v934_v59, %v933_v57  ;;  %v1365_v0 = vpop.eup %1364 }
 0x389   :  { %v820_v61 = vpop.xlane.xlu2 %819  ;;  %v835_v29 = vmul.f32 %v1365_v0, %v1799_v41 }
 0x38a   :  { %1366 = vrcp.f32 %v820_v61  ;;  %985 = vperm.xlu2 %1335, %v935_v60  }
 0x38b   :  { %1368 = vrcp.f32 %v814_v62 }
 0x38c   :  { %v892_v1 = vpop.permute.xlu0 %891 }
 0x390   :  { %v1367_v63 = vpop.eup %1366 }
 0x391   :  { %v836_v11 = vmul.f32 %v1367_v63, %v1803_v45  ;;  %v885_v47 = vpop.permute.xlu2 %884  ;;  %v1369_v5 = vpop.eup %1368 }
 0x392   :  { %v899_v19 = vmul.f32 %v885_v47, %v835_v29  ;;  %v834_v58 = vmul.f32 %v1369_v5, %v1794_v37 }
 0x393   :  { %v900_v15 = vmul.f32 %v892_v1, %v836_v11 }
 0x394   :  { %v943_v3 = vsel %vm748_vm6, %v899_v19, 0.0 }
 0x395   :  { %v950_v6 = vsel %vm748_vm6, %v900_v15, 0.0  ;;  %v944_v7 = vrot.slane %v943_v3, 4 }
 0x396   :  { %v951_v28 = vrot.slane %v950_v6, 4 }
 0x397   :  { %v945_v4 = vadd.f32 %v944_v7, %v943_v3 }
 0x398   :  { %v952_v53 = vadd.f32 %v951_v28, %v950_v6 }
 0x399   :  { %v946_v10 = vrot.slane %v945_v4, 2  ;;  %v878_v16 = vpop.permute.xlu1 %877 }
 0x39a   :  { %v953_v41 = vrot.slane %v952_v53, 2  ;;  %v898_v17 = vmul.f32 %v878_v16, %v834_v58 }
 0x39b   :  { %v947_v45 = vadd.f32 %v946_v10, %v945_v4 }
 0x39c   :  { %v954_v21 = vadd.f32 %v953_v41, %v952_v53  ;;  %v936_v9 = vsel %vm748_vm6, %v898_v17, 0.0 }
 0x39d   :  { %v937_v22 = vrot.slane %v936_v9, 4  ;;  %v948_v23 = vrot.slane %v947_v45, 1 }
 0x39e   :  { %v955_v25 = vrot.slane %v954_v21, 1 }
 0x39f   :  { %v938_v8 = vadd.f32 %v937_v22, %v936_v9  ;;  %v949_v26 = vadd.f32 %v948_v23, %v947_v45 }
 0x3a0   :  { %v956_v30 = vadd.f32 %v955_v25, %v954_v21 }
 0x3a1   :  { %v939_v33 = vrot.slane %v938_v8, 2  ;;  %997 = vperm.xlu1 %1334, %v949_v26  }
 0x3a2   :  { %1003 = vperm.xlu2 %1335, %v956_v30  }
 0x3a3   :  { %v940_v20 = vadd.f32 %v939_v33, %v938_v8 }
 0x3a5   :  { %v941_v35 = vrot.slane %v940_v20, 1 }
 0x3a7   :  { %v942_v37 = vadd.f32 %v941_v35, %v940_v20 }
 0x3a9   :  { %991 = vperm.xlu0 %1333, %v942_v37  }
 0x3bd   :  { %v968_v36 = vpop.permute.xlu2 %967 }
 0x3be   :  { %v1006_v46 = vmul.f32 %v968_v36, %v1674_v18 }
 0x3c0   :  { %v1020_v51 = vsel %vm421_vm4, %v1006_v46, 0.0 }
 0x3cf   :  { %v962_v38 = vpop.permute.xlu1 %961 }
 0x3d0   :  { %v1005_v42 = vmul.f32 %v962_v38, %v1669_v13  ;;  %v1021_v13 = vrot.slane %v1020_v51, 4 }
 0x3d2   :  { %v1013_v49 = vsel %vm421_vm4, %v1005_v42, 0.0  ;;  %v1022_v60 = vadd.f32 %v1021_v13, %v1020_v51 }
 0x3d3   :  { %v1014_v52 = vrot.slane %v1013_v49, 4 }
 0x3d4   :  { %v1023_v1 = vrot.slane %v1022_v60, 2 }
 0x3d6   :  { %v1024_v28 = vadd.f32 %v1023_v1, %v1022_v60 }
 0x3d8   :  { %v1025_v21 = vrot.slane %v1024_v28, 1 }
 0x3da   :  { %v1026_v20 = vadd.f32 %v1025_v21, %v1024_v28 }
 0x3db   :  { %v974_v27 = vpop.permute.xlu0 %973 }
 0x3dc   :  { %v1007_v43 = vmul.f32 %v974_v27, %v1681_v24 }
 0x3de   :  { %v1027_v2 = vsel %vm421_vm4, %v1007_v43, 0.0 }
 0x3df   :  { %v1028_v55 = vrot.slane %v1027_v2, 4 }
 0x3e1   :  { %v1029_v57 = vadd.f32 %v1028_v55, %v1027_v2 }
 0x3e3   :  { %v980_v39 = vpop.permute.xlu1 %979  ;;  %v1030_v29 = vrot.slane %v1029_v57, 2 }
 0x3e4   :  { %v986_v31 = vpop.permute.xlu2 %985  ;;  %v1008_v48 = vmul.f32 %v980_v39, %v1686_v14  ;;  %v1015_v14 = vadd.f32 %v1014_v52, %v1013_v49 }
 0x3e5   :  { %v1009_v50 = vmul.f32 %v986_v31, %v1693_v34  ;;  %v1031_v5 = vadd.f32 %v1030_v29, %v1029_v57 }
 0x3e6   :  { %v1034_v12 = vsel %vm421_vm4, %v1008_v48, 0.0  ;;  %v1016_v63 = vrot.slane %v1015_v14, 2 }
 0x3e7   :  { %v1035_v56 = vrot.slane %v1034_v12, 4  ;;  %v1041_v24 = vsel %vm421_vm4, %v1009_v50, 0.0  ;;  %v1032_v16 = vrot.slane %v1031_v5, 1 }
 0x3e8   :  { %v1042_v59 = vrot.slane %v1041_v24, 4 }
 0x3e9   :  { %v1036_v61 = vadd.f32 %v1035_v56, %v1034_v12  ;;  %v1033_v26 = vadd.f32 %v1032_v16, %v1031_v5 }
 0x3ea   :  { %v1043_v11 = vadd.f32 %v1042_v59, %v1041_v24 }
 0x3eb   :  { %v1037_v19 = vrot.slane %v1036_v61, 2 }
 0x3ec   :  { %v1044_v6 = vrot.slane %v1043_v11, 2 }
 0x3ed   :  { %v1038_v4 = vadd.f32 %v1037_v19, %v1036_v61 }
 0x3ee   :  { %v1045_v41 = vadd.f32 %v1044_v6, %v1043_v11 }
 0x3ef   :  { %v1039_v9 = vrot.slane %v1038_v4, 1 }
 0x3f0   :  { %v1046_v30 = vrot.slane %v1045_v41, 1 }
 0x3f1   :  { %v1040_v35 = vadd.f32 %v1039_v9, %v1038_v4 }
 0x3f2   :  { %v1047_v39 = vadd.f32 %v1046_v30, %v1045_v41 }
 0x3fc   :  { %v1004_v54 = vpop.permute.xlu2 %1003 }
 0x3fd   :  { %v1012_v18 = vmul.f32 %v1004_v54, %v1710_v44  ;;  %v1017_v44 = vadd.f32 %v1016_v63, %v1015_v14 }
 0x3ff   :  { %v1062_v34 = vsel %vm421_vm4, %v1012_v18, 0.0 }
 0x400   :  { %v1063_v15 = vrot.slane %v1062_v34, 4 }
 0x402   :  { %v1064_v53 = vadd.f32 %v1063_v15, %v1062_v34 }
 0x404   :  { %v1065_v22 = vrot.slane %v1064_v53, 2 }
 0x413   :  { %v998_v62 = vpop.permute.xlu1 %997 }
 0x414   :  { %v1011_v0 = vmul.f32 %v998_v62, %v1704_v40  ;;  %v1018_v40 = vrot.slane %v1017_v44, 1 }
 0x416   :  { %v1055_v47 = vsel %vm421_vm4, %v1011_v0, 0.0  ;;  %v1019_v25 = vadd.f32 %v1018_v40, %v1017_v44 }
 0x417   :  { %v1056_v3 = vrot.slane %v1055_v47, 4 }
 0x418   :  { %v1078_v36 = vsel %vm1077_vm7, %v1026_v20, %v1019_v25 }
 0x419   :  { %v1057_v7 = vadd.f32 %v1056_v3, %v1055_v47  ;;  %v1080_v27 = vsel %vm1079_vm8, %v1033_v26, %v1078_v36 }
 0x41a   :  { %v1082_v42 = vsel %vm1081_vm9, %v1040_v35, %v1080_v27 }
 0x41b   :  { %v992_v58 = vpop.permute.xlu0 %991  ;;  %v1058_v17 = vrot.slane %v1057_v7, 2  ;;  %v1084_v2 = vsel %vm1083_vm10, %v1047_v39, %v1082_v42 }
 0x41c   :  { %v1010_v10 = vmul.f32 %v992_v58, %v1698_v32  ;;  %v1066_v32 = vadd.f32 %v1065_v22, %v1064_v53 }
 0x41d   :  { %v1059_v33 = vadd.f32 %v1058_v17, %v1057_v7 }
 0x41e   :  { %v1048_v45 = vsel %vm421_vm4, %v1010_v10, 0.0  ;;  %v1067_v43 = vrot.slane %v1066_v32, 1 }
 0x41f   :  { %v1049_v23 = vrot.slane %v1048_v45, 4  ;;  %v1060_v31 = vrot.slane %v1059_v33, 1 }
 0x420   :  { %v1068_v50 = vadd.f32 %v1067_v43, %v1066_v32 }
 0x421   :  { %v1050_v8 = vadd.f32 %v1049_v23, %v1048_v45  ;;  %v1061_v49 = vadd.f32 %v1060_v31, %v1059_v33 }
 0x423   :  { %v1051_v37 = vrot.slane %v1050_v8, 2 }
 0x425   :  { %v1052_v38 = vadd.f32 %v1051_v37, %v1050_v8 }
 0x427   :  { %v1053_v46 = vrot.slane %v1052_v38, 1 }
 0x429   :  { %v1054_v48 = vadd.f32 %v1053_v46, %v1052_v38 }
 0x42b   :  { %v1086_v51 = vsel %vm1085_vm11, %v1054_v48, %v1084_v2 }
 0x42c   :  { %v1088_v12 = vsel %vm1087_vm12, %v1061_v49, %v1086_v51 }
 0x42d   :  { %v1090_v52 = vsel %vm1089_vm13, %v1068_v50, %v1088_v12 }
 0x42e   :  { %v1092_v54 = vsel %vm421_vm4, %v1090_v52, 0.0 }
 0x42f   :  { %1093 = vst [vmem:[#allocation2] sm:$0xff] %v1092_v54 }
 0x430   :  { %1104 = dma.vmem_to_hbm [thread:$0]  %s1100_s30, 128, %s1102_s14, [#allocation3]  }
 0x431   :  { %1394 = dma.done.wait [#allocation3], 128  }
 0x432   :  { %1395 = vsyncadd [#allocation3], 4294967168 }
 0x433   :  { %1109 = vsyncpa [#allocation3], 1 }

</bundles_post_ra>
